<compile_context>
chip_gen: v7x
topology: tpu7x:2x2x1
jax: 0.10.0
libtpu: 0.0.40
codegen_flags: <defaults>
</compile_context>

<pallas_src>
import functools

import jax
import jax.numpy as jnp
from jax.experimental import pallas as pl
from jax.experimental.pallas import tpu as pltpu

BN_EPS = 1e-5      # torch.nn.BatchNorm1d default
NORM_EPS = 1e-12   # torch.nn.functional.normalize default


def _pixel_tile(hw: int) -> int:
    # Largest lane-aligned (multiple-of-128) tile that divides HW and still
    # leaves >= 2 grid steps (so the DMA pipeline / accumulator path is
    # exercised); otherwise fall back to a single full-width tile.
    for t in (512, 384, 256, 128):
        if hw % t == 0 and hw // t >= 2:
            return t
    return hw


def _contrastive_kernel(x_ref,                    # [B, C, PT]   bf16 (pixels on lanes)
                        wenc_ref,                 # [F, C]       bf16 (pre-transposed)
                        benc_ref,                 # [F, 1]       f32
                        w1_ref, b1_ref, g1_ref, be1_ref,   # first_head (width padded to EP)
                        w2_ref, b2_ref, g2_ref, be2_ref,   # second_head Linear + BN
                        w3_ref, b3_ref,                    # second_head final Linear
                        out_ref,                  # [B, EP]      f32
                        feat_acc_ref,             # [B, F]       f32 scratch accumulator
                        *, hw):
    k = pl.program_id(0)
    nk = pl.num_programs(0)

    @pl.when(k == 0)
    def _init():
        feat_acc_ref[...] = jnp.zeros_like(feat_acc_ref)

    # ---- synthetic encoder tile: 1x1 conv (per-pixel linear) + ReLU + pool ----
    x = x_ref[...]                                  # [B, C, PT] bf16
    wt = wenc_ref[...]                              # [F, C]     bf16
    benc = benc_ref[...]                            # [F, 1]     f32
    bsz = x.shape[0]
    # B small per-sample [F,C]@[C,PT] matmuls; lane-dense on the pixel axis.
    h = jnp.stack(
        [jnp.dot(wt, x[b], preferred_element_type=jnp.float32) for b in range(bsz)],
        axis=0)                                     # [B, F, PT] f32
    h = jnp.maximum(h + benc[None, :, :], 0.0)
    feat_acc_ref[...] += jnp.sum(h, axis=2)         # partial pixel sums -> [B, F]

    # ---- heads + normalize, once the pooled features are complete ------------
    @pl.when(k == nk - 1)
    def _finish():
        feat = feat_acc_ref[...] * (1.0 / hw)       # global average pool  [B, F]

        def linear(z, w_ref, b_ref):
            return jnp.dot(z, w_ref[...],
                           preferred_element_type=jnp.float32) + b_ref[...]

        def bn_relu(z, g_ref, b_ref):
            # training-mode BatchNorm1d: biased batch statistics over dim 0
            mu = jnp.mean(z, axis=0, keepdims=True)
            d = z - mu
            var = jnp.mean(d * d, axis=0, keepdims=True)
            zn = d * jax.lax.rsqrt(var + BN_EPS)
            return jnp.maximum(zn * g_ref[...] + b_ref[...], 0.0)

        z = bn_relu(linear(feat, w1_ref, b1_ref), g1_ref, be1_ref)   # first_head
        z = bn_relu(linear(z, w2_ref, b2_ref), g2_ref, be2_ref)      # second_head BN block
        z = linear(z, w3_ref, b3_ref)                                # second_head Linear
        # F.normalize(dim=1): z / max(||z||, eps) == z * rsqrt(max(||z||^2, eps^2))
        ss = jnp.sum(z * z, axis=1, keepdims=True)
        out_ref[...] = z * jax.lax.rsqrt(jnp.maximum(ss, NORM_EPS * NORM_EPS))


@jax.jit
def contrastive_forward(x_nchw, params):
    """x_nchw: [B, C, H, W] float32 -> L2-normalized embeddings [B, E]."""
    B, C, H, W = x_nchw.shape
    HW = H * W
    F_dim = params['w_enc'].shape[1]
    E = params['w3'].shape[1]
    EP = ((E + 127) // 128) * 128                   # lane-dense head width

    # Layout: keep NCHW; just flatten H,W so pixels land on the 128-wide lane axis.
    x = x_nchw.reshape(B, C, HW).astype(jnp.bfloat16)
    w_enc_t = jnp.transpose(params['w_enc']).astype(jnp.bfloat16)    # [F, C]
    b_enc = params['b_enc'].reshape(F_dim, 1)                        # [F, 1]

    padE = EP - E
    pad_c = lambda a, v=0.0: jnp.pad(a, ((0, 0), (0, padE)), constant_values=v)
    w1 = pad_c(params['w1']); b1 = pad_c(params['b1'])
    g1 = pad_c(params['g1'], 1.0); be1 = pad_c(params['be1'])
    w2 = jnp.pad(params['w2'], ((0, padE), (0, padE)))
    b2 = pad_c(params['b2']); g2 = pad_c(params['g2'], 1.0); be2 = pad_c(params['be2'])
    w3 = jnp.pad(params['w3'], ((0, padE), (0, padE)))
    b3 = pad_c(params['b3'])

    p_tile = _pixel_tile(HW)
    grid = (HW // p_tile,)

    args = (x, w_enc_t, b_enc, w1, b1, g1, be1, w2, b2, g2, be2, w3, b3)
    in_specs = [pl.BlockSpec((B, C, p_tile), lambda k: (0, 0, k))]
    in_specs += [pl.BlockSpec(a.shape, lambda k: (0, 0)) for a in args[1:]]

    flops = 2 * B * HW * C * F_dim + 2 * B * (F_dim * EP + 2 * EP * EP)
    bytes_accessed = int(sum(a.size * a.dtype.itemsize for a in args) + B * EP * 4)

    out_padded = pl.pallas_call(
        functools.partial(_contrastive_kernel, hw=float(HW)),
        out_shape=jax.ShapeDtypeStruct((B, EP), jnp.float32),
        grid=grid,
        in_specs=in_specs,
        out_specs=pl.BlockSpec((B, EP), lambda k: (0, 0)),
        scratch_shapes=[pltpu.VMEM((B, F_dim), jnp.float32)],
        compiler_params=pltpu.CompilerParams(
            dimension_semantics=("arbitrary",)),     # pixel axis carries the accumulator
        cost_estimate=pl.CostEstimate(
            flops=flops, transcendentals=2 * EP + B,
            bytes_accessed=bytes_accessed),
    )(*args)
    return out_padded[:, :E]


def init_params(key, channels, features_dim, embed_dim):
    ks = jax.random.split(key, 8)

    def lin(k, fan_in, fan_out):
        bound = 1.0 / jnp.sqrt(fan_in)
        kw, kb = jax.random.split(k)
        w = jax.random.uniform(kw, (fan_in, fan_out), jnp.float32, -bound, bound)
        b = jax.random.uniform(kb, (1, fan_out), jnp.float32, -bound, bound)
        return w, b

    w_enc, b_enc = lin(ks[0], channels, features_dim)
    w1, b1 = lin(ks[1], features_dim, embed_dim)
    w2, b2 = lin(ks[2], embed_dim, embed_dim)
    w3, b3 = lin(ks[3], embed_dim, embed_dim)
    ones = jnp.ones((1, embed_dim), jnp.float32)
    zeros = jnp.zeros((1, embed_dim), jnp.float32)
    return dict(w_enc=w_enc, b_enc=b_enc,
                w1=w1, b1=b1, g1=ones, be1=zeros,
                w2=w2, b2=b2, g2=ones, be2=zeros,
                w3=w3, b3=b3)


def reference_forward(x_nchw, p):
    B, C, H, W = x_nchw.shape
    # Same bf16 encoder inputs as the kernel (f32 accumulation), rest f32.
    x = x_nchw.reshape(B, C, H * W).astype(jnp.bfloat16)
    w = p['w_enc'].astype(jnp.bfloat16)
    h = jnp.einsum('bcp,cf->bpf', x, w, preferred_element_type=jnp.float32)
    h = jnp.maximum(h + p['b_enc'], 0.0)
    feat = jnp.mean(h, axis=1)

    def bn_relu(z, g, b):
        mu = jnp.mean(z, axis=0, keepdims=True)
        var = jnp.mean((z - mu) ** 2, axis=0, keepdims=True)
        return jnp.maximum((z - mu) * jax.lax.rsqrt(var + BN_EPS) * g + b, 0.0)

    z = bn_relu(feat @ p['w1'] + p['b1'], p['g1'], p['be1'])
    z = bn_relu(z @ p['w2'] + p['b2'], p['g2'], p['be2'])
    z = z @ p['w3'] + p['b3']
    norm = jnp.linalg.norm(z, axis=1, keepdims=True)
    return z / jnp.maximum(norm, NORM_EPS)


if __name__ == "__main__":
    # Small shapes consistent with the module.  Batch of 8 so that training-mode
    # BatchNorm1d batch statistics are well-conditioned and sublane-aligned.
    B, C, H, W = 8, 4, 16, 16
    FEATURES_DIM = 64   # encoder feature width (args-dependent in the original)
    EMBED_DIM = 32      # args.hidden

    key = jax.random.PRNGKey(0)
    k_x, k_p = jax.random.split(key)
    x = jax.random.normal(k_x, (B, C, H, W), jnp.float32)
    params = init_params(k_p, C, FEATURES_DIM, EMBED_DIM)

    out = jax.block_until_ready(contrastive_forward(x, params))
    ref = reference_forward(x, params)

    assert out.shape == (B, EMBED_DIM)
    max_err = float(jnp.max(jnp.abs(out - ref)))
    assert jnp.allclose(out, ref, atol=2e-3, rtol=2e-3), \
        f"mismatch vs reference (max abs err {max_err})"

    print("KERNEL_OK")
</pallas_src>

<mosaic_0001>
module attributes {stable_mosaic.version = 11 : i64} {
  func.func @_contrastive_kernel(%arg0: i32, %arg1: memref<8x4x128xbf16, #tpu.memory_space<vmem>>, %arg2: memref<64x4xbf16, #tpu.memory_space<vmem>>, %arg3: memref<64x1xf32, #tpu.memory_space<vmem>>, %arg4: memref<64x128xf32, #tpu.memory_space<vmem>>, %arg5: memref<1x128xf32, #tpu.memory_space<vmem>>, %arg6: memref<1x128xf32, #tpu.memory_space<vmem>>, %arg7: memref<1x128xf32, #tpu.memory_space<vmem>>, %arg8: memref<128x128xf32, #tpu.memory_space<vmem>>, %arg9: memref<1x128xf32, #tpu.memory_space<vmem>>, %arg10: memref<1x128xf32, #tpu.memory_space<vmem>>, %arg11: memref<1x128xf32, #tpu.memory_space<vmem>>, %arg12: memref<128x128xf32, #tpu.memory_space<vmem>>, %arg13: memref<1x128xf32, #tpu.memory_space<vmem>>, %arg14: memref<8x128xf32, #tpu.memory_space<vmem>>, %arg15: memref<8x64xf32, #tpu.memory_space<vmem>>) attributes {dimension_semantics = [#tpu.dimension_semantics<arbitrary>], iteration_bounds = array<i64: 2>, scalar_prefetch = 0 : i64, scratch_operands = 1 : i64, tpu.core_type = #tpu.core_type<tc>, window_params = [{transform_indices = @transform_0, window_bounds = array<i64: 8, 4, 128>}, {pipeline_mode = #tpu.pipeline_mode<synchronous>, transform_indices = @transform_1, window_bounds = array<i64: 64, 4>}, {pipeline_mode = #tpu.pipeline_mode<synchronous>, transform_indices = @transform_2, window_bounds = array<i64: 64, 1>}, {pipeline_mode = #tpu.pipeline_mode<synchronous>, transform_indices = @transform_3, window_bounds = array<i64: 64, 128>}, {pipeline_mode = #tpu.pipeline_mode<synchronous>, transform_indices = @transform_4, window_bounds = array<i64: 1, 128>}, {pipeline_mode = #tpu.pipeline_mode<synchronous>, transform_indices = @transform_5, window_bounds = array<i64: 1, 128>}, {pipeline_mode = #tpu.pipeline_mode<synchronous>, transform_indices = @transform_6, window_bounds = array<i64: 1, 128>}, {pipeline_mode = #tpu.pipeline_mode<synchronous>, transform_indices = @transform_7, window_bounds = array<i64: 128, 128>}, {pipeline_mode = #tpu.pipeline_mode<synchronous>, transform_indices = @transform_8, window_bounds = array<i64: 1, 128>}, {pipeline_mode = #tpu.pipeline_mode<synchronous>, transform_indices = @transform_9, window_bounds = array<i64: 1, 128>}, {pipeline_mode = #tpu.pipeline_mode<synchronous>, transform_indices = @transform_10, window_bounds = array<i64: 1, 128>}, {pipeline_mode = #tpu.pipeline_mode<synchronous>, transform_indices = @transform_11, window_bounds = array<i64: 128, 128>}, {pipeline_mode = #tpu.pipeline_mode<synchronous>, transform_indices = @transform_12, window_bounds = array<i64: 1, 128>}, {pipeline_mode = #tpu.pipeline_mode<synchronous>, transform_indices = @transform_13, window_bounds = array<i64: 8, 128>}]} {
    %c0_i32 = arith.constant 0 : i32
    %0 = arith.cmpi eq, %arg0, %c0_i32 : i32
    %1 = arith.extui %0 : i1 to i32
    %c0_i32_0 = arith.constant 0 : i32
    %2 = arith.cmpi ne, %1, %c0_i32_0 : i32
    scf.if %2 {
      %cst_21 = arith.constant 0.000000e+00 : f32
      %51 = vector.broadcast %cst_21 : f32 to vector<8x64xf32>
      %c0_22 = arith.constant 0 : index
      %c0_23 = arith.constant 0 : index
      %52 = vector.load %arg15[%c0_22, %c0_23] : memref<8x64xf32, #tpu.memory_space<vmem>>, vector<8x64xf32>
      tpu.vector_store %arg15[%c0_22, %c0_23], %51 {strides = array<i32>} : memref<8x64xf32, #tpu.memory_space<vmem>>, vector<8x64xf32>,
    } else {
    }
    %c0 = arith.constant 0 : index
    %c0_1 = arith.constant 0 : index
    %c0_2 = arith.constant 0 : index
    %3 = vector.load %arg1[%c0, %c0_1, %c0_2] : memref<8x4x128xbf16, #tpu.memory_space<vmem>>, vector<8x4x128xbf16>
    %c0_3 = arith.constant 0 : index
    %c0_4 = arith.constant 0 : index
    %4 = vector.load %arg2[%c0_3, %c0_4] : memref<64x4xbf16, #tpu.memory_space<vmem>>, vector<64x4xbf16>
    %c0_5 = arith.constant 0 : index
    %c0_6 = arith.constant 0 : index
    %5 = vector.load %arg3[%c0_5, %c0_6] : memref<64x1xf32, #tpu.memory_space<vmem>>, vector<64x1xf32>
    %6 = vector.extract_strided_slice %3 {offsets = [0, 0, 0], sizes = [1, 4, 128], strides = [1, 1, 1]} : vector<8x4x128xbf16> to vector<1x4x128xbf16>
    %7 = vector.shape_cast %6 : vector<1x4x128xbf16> to vector<4x128xbf16>
    %cst = arith.constant dense<0.000000e+00> : vector<64x128xf32>
    %8 = tpu.matmul %4, %7, %cst {dimension_numbers = #tpu.dot_dimension_numbers<[1], [0], [0], [1], [0, 0, 1, 1], [], []>} : vector<64x4xbf16>, vector<4x128xbf16>, vector<64x128xf32> -> vector<64x128xf32>
    %9 = vector.extract_strided_slice %3 {offsets = [1, 0, 0], sizes = [1, 4, 128], strides = [1, 1, 1]} : vector<8x4x128xbf16> to vector<1x4x128xbf16>
    %10 = vector.shape_cast %9 : vector<1x4x128xbf16> to vector<4x128xbf16>
    %cst_7 = arith.constant dense<0.000000e+00> : vector<64x128xf32>
    %11 = tpu.matmul %4, %10, %cst_7 {dimension_numbers = #tpu.dot_dimension_numbers<[1], [0], [0], [1], [0, 0, 1, 1], [], []>} : vector<64x4xbf16>, vector<4x128xbf16>, vector<64x128xf32> -> vector<64x128xf32>
    %12 = vector.extract_strided_slice %3 {offsets = [2, 0, 0], sizes = [1, 4, 128], strides = [1, 1, 1]} : vector<8x4x128xbf16> to vector<1x4x128xbf16>
    %13 = vector.shape_cast %12 : vector<1x4x128xbf16> to vector<4x128xbf16>
    %cst_8 = arith.constant dense<0.000000e+00> : vector<64x128xf32>
    %14 = tpu.matmul %4, %13, %cst_8 {dimension_numbers = #tpu.dot_dimension_numbers<[1], [0], [0], [1], [0, 0, 1, 1], [], []>} : vector<64x4xbf16>, vector<4x128xbf16>, vector<64x128xf32> -> vector<64x128xf32>
    %15 = vector.extract_strided_slice %3 {offsets = [3, 0, 0], sizes = [1, 4, 128], strides = [1, 1, 1]} : vector<8x4x128xbf16> to vector<1x4x128xbf16>
    %16 = vector.shape_cast %15 : vector<1x4x128xbf16> to vector<4x128xbf16>
    %cst_9 = arith.constant dense<0.000000e+00> : vector<64x128xf32>
    %17 = tpu.matmul %4, %16, %cst_9 {dimension_numbers = #tpu.dot_dimension_numbers<[1], [0], [0], [1], [0, 0, 1, 1], [], []>} : vector<64x4xbf16>, vector<4x128xbf16>, vector<64x128xf32> -> vector<64x128xf32>
    %18 = vector.extract_strided_slice %3 {offsets = [4, 0, 0], sizes = [1, 4, 128], strides = [1, 1, 1]} : vector<8x4x128xbf16> to vector<1x4x128xbf16>
    %19 = vector.shape_cast %18 : vector<1x4x128xbf16> to vector<4x128xbf16>
    %cst_10 = arith.constant dense<0.000000e+00> : vector<64x128xf32>
    %20 = tpu.matmul %4, %19, %cst_10 {dimension_numbers = #tpu.dot_dimension_numbers<[1], [0], [0], [1], [0, 0, 1, 1], [], []>} : vector<64x4xbf16>, vector<4x128xbf16>, vector<64x128xf32> -> vector<64x128xf32>
    %21 = vector.extract_strided_slice %3 {offsets = [5, 0, 0], sizes = [1, 4, 128], strides = [1, 1, 1]} : vector<8x4x128xbf16> to vector<1x4x128xbf16>
    %22 = vector.shape_cast %21 : vector<1x4x128xbf16> to vector<4x128xbf16>
    %cst_11 = arith.constant dense<0.000000e+00> : vector<64x128xf32>
    %23 = tpu.matmul %4, %22, %cst_11 {dimension_numbers = #tpu.dot_dimension_numbers<[1], [0], [0], [1], [0, 0, 1, 1], [], []>} : vector<64x4xbf16>, vector<4x128xbf16>, vector<64x128xf32> -> vector<64x128xf32>
    %24 = vector.extract_strided_slice %3 {offsets = [6, 0, 0], sizes = [1, 4, 128], strides = [1, 1, 1]} : vector<8x4x128xbf16> to vector<1x4x128xbf16>
    %25 = vector.shape_cast %24 : vector<1x4x128xbf16> to vector<4x128xbf16>
    %cst_12 = arith.constant dense<0.000000e+00> : vector<64x128xf32>
    %26 = tpu.matmul %4, %25, %cst_12 {dimension_numbers = #tpu.dot_dimension_numbers<[1], [0], [0], [1], [0, 0, 1, 1], [], []>} : vector<64x4xbf16>, vector<4x128xbf16>, vector<64x128xf32> -> vector<64x128xf32>
    %27 = vector.extract_strided_slice %3 {offsets = [7, 0, 0], sizes = [1, 4, 128], strides = [1, 1, 1]} : vector<8x4x128xbf16> to vector<1x4x128xbf16>
    %28 = vector.shape_cast %27 : vector<1x4x128xbf16> to vector<4x128xbf16>
    %cst_13 = arith.constant dense<0.000000e+00> : vector<64x128xf32>
    %29 = tpu.matmul %4, %28, %cst_13 {dimension_numbers = #tpu.dot_dimension_numbers<[1], [0], [0], [1], [0, 0, 1, 1], [], []>} : vector<64x4xbf16>, vector<4x128xbf16>, vector<64x128xf32> -> vector<64x128xf32>
    %30 = vector.shape_cast %8 : vector<64x128xf32> to vector<1x64x128xf32>
    %31 = vector.shape_cast %11 : vector<64x128xf32> to vector<1x64x128xf32>
    %32 = vector.shape_cast %14 : vector<64x128xf32> to vector<1x64x128xf32>
    %33 = vector.shape_cast %17 : vector<64x128xf32> to vector<1x64x128xf32>
    %34 = vector.shape_cast %20 : vector<64x128xf32> to vector<1x64x128xf32>
    %35 = vector.shape_cast %23 : vector<64x128xf32> to vector<1x64x128xf32>
    %36 = vector.shape_cast %26 : vector<64x128xf32> to vector<1x64x128xf32>
    %37 = vector.shape_cast %29 : vector<64x128xf32> to vector<1x64x128xf32>
    %38 = tpu.concatenate %30, %31, %32, %33, %34, %35, %36, %37 in 0 : vector<1x64x128xf32>, vector<1x64x128xf32>, vector<1x64x128xf32>, vector<1x64x128xf32>, vector<1x64x128xf32>, vector<1x64x128xf32>, vector<1x64x128xf32>, vector<1x64x128xf32> -> vector<8x64x128xf32>
    %39 = vector.shape_cast %5 : vector<64x1xf32> to vector<1x64x1xf32>
    %40 = vector.broadcast %39 : vector<1x64x1xf32> to vector<8x64x128xf32>
    %41 = arith.addf %38, %40 : vector<8x64x128xf32>
    %cst_14 = arith.constant 0.000000e+00 : f32
    %42 = vector.broadcast %cst_14 : f32 to vector<8x64x128xf32>
    %43 = arith.maximumf %41, %42 : vector<8x64x128xf32>
    %c0_15 = arith.constant 0 : index
    %c0_16 = arith.constant 0 : index
    %44 = vector.load %arg15[%c0_15, %c0_16] : memref<8x64xf32, #tpu.memory_space<vmem>>, vector<8x64xf32>
    %cst_17 = arith.constant dense<0.000000e+00> : vector<8x64xf32>
    %45 = vector.multi_reduction <add>, %43, %cst_17 [2] : vector<8x64x128xf32> to vector<8x64xf32>
    %46 = arith.addf %44, %45 : vector<8x64xf32>
    %c0_18 = arith.constant 0 : index
    %c0_19 = arith.constant 0 : index
    %47 = vector.load %arg15[%c0_18, %c0_19] : memref<8x64xf32, #tpu.memory_space<vmem>>, vector<8x64xf32>
    tpu.vector_store %arg15[%c0_18, %c0_19], %46 {strides = array<i32>} : memref<8x64xf32, #tpu.memory_space<vmem>>, vector<8x64xf32>,
    %c1_i32 = arith.constant 1 : i32
    %48 = arith.cmpi eq, %arg0, %c1_i32 : i32
    %49 = arith.extui %48 : i1 to i32
    %c0_i32_20 = arith.constant 0 : i32
    %50 = arith.cmpi ne, %49, %c0_i32_20 : i32
    scf.if %50 {
      %c0_21 = arith.constant 0 : index
      %c0_22 = arith.constant 0 : index
      %51 = vector.load %arg15[%c0_21, %c0_22] : memref<8x64xf32, #tpu.memory_space<vmem>>, vector<8x64xf32>
      %cst_23 = arith.constant 3.906250e-03 : f32
      %52 = vector.broadcast %cst_23 : f32 to vector<8x64xf32>
      %53 = arith.mulf %51, %52 : vector<8x64xf32>
      %c0_24 = arith.constant 0 : index
      %c0_25 = arith.constant 0 : index
      %54 = vector.load %arg4[%c0_24, %c0_25] : memref<64x128xf32, #tpu.memory_space<vmem>>, vector<64x128xf32>
      %cst_26 = arith.constant dense<0.000000e+00> : vector<8x128xf32>
      %55 = tpu.matmul %53, %54, %cst_26 {dimension_numbers = #tpu.dot_dimension_numbers<[1], [0], [0], [1], [0, 0, 1, 1], [], []>} : vector<8x64xf32>, vector<64x128xf32>, vector<8x128xf32> -> vector<8x128xf32>
      %c0_27 = arith.constant 0 : index
      %c0_28 = arith.constant 0 : index
      %56 = vector.load %arg5[%c0_27, %c0_28] : memref<1x128xf32, #tpu.memory_space<vmem>>, vector<1x128xf32>
      %57 = vector.broadcast %56 : vector<1x128xf32> to vector<8x128xf32>
      %58 = arith.addf %55, %57 : vector<8x128xf32>
      %cst_29 = arith.constant dense<0.000000e+00> : vector<128xf32>
      %59 = vector.multi_reduction <add>, %58, %cst_29 [0] : vector<8x128xf32> to vector<128xf32>
      %60 = vector.shape_cast %59 : vector<128xf32> to vector<1x128xf32>
      %cst_30 = arith.constant 8.000000e+00 : f32
      %61 = vector.broadcast %cst_30 : f32 to vector<1x128xf32>
      %62 = arith.divf %60, %61 : vector<1x128xf32>
      %63 = vector.broadcast %62 : vector<1x128xf32> to vector<8x128xf32>
      %64 = arith.subf %58, %63 : vector<8x128xf32>
      %65 = arith.mulf %64, %64 : vector<8x128xf32>
      %cst_31 = arith.constant dense<0.000000e+00> : vector<128xf32>
      %66 = vector.multi_reduction <add>, %65, %cst_31 [0] : vector<8x128xf32> to vector<128xf32>
      %67 = vector.shape_cast %66 : vector<128xf32> to vector<1x128xf32>
      %cst_32 = arith.constant 8.000000e+00 : f32
      %68 = vector.broadcast %cst_32 : f32 to vector<1x128xf32>
      %69 = arith.divf %67, %68 : vector<1x128xf32>
      %cst_33 = arith.constant 9.99999974E-6 : f32
      %70 = vector.broadcast %cst_33 : f32 to vector<1x128xf32>
      %71 = arith.addf %69, %70 : vector<1x128xf32>
      %72 = math.rsqrt %71 : vector<1x128xf32>
      %73 = vector.broadcast %72 : vector<1x128xf32> to vector<8x128xf32>
      %74 = arith.mulf %64, %73 : vector<8x128xf32>
      %c0_34 = arith.constant 0 : index
      %c0_35 = arith.constant 0 : index
      %75 = vector.load %arg6[%c0_34, %c0_35] : memref<1x128xf32, #tpu.memory_space<vmem>>, vector<1x128xf32>
      %76 = vector.broadcast %75 : vector<1x128xf32> to vector<8x128xf32>
      %77 = arith.mulf %74, %76 : vector<8x128xf32>
      %c0_36 = arith.constant 0 : index
      %c0_37 = arith.constant 0 : index
      %78 = vector.load %arg7[%c0_36, %c0_37] : memref<1x128xf32, #tpu.memory_space<vmem>>, vector<1x128xf32>
      %79 = vector.broadcast %78 : vector<1x128xf32> to vector<8x128xf32>
      %80 = arith.addf %77, %79 : vector<8x128xf32>
      %cst_38 = arith.constant 0.000000e+00 : f32
      %81 = vector.broadcast %cst_38 : f32 to vector<8x128xf32>
      %82 = arith.maximumf %80, %81 : vector<8x128xf32>
      %c0_39 = arith.constant 0 : index
      %c0_40 = arith.constant 0 : index
      %83 = vector.load %arg8[%c0_39, %c0_40] : memref<128x128xf32, #tpu.memory_space<vmem>>, vector<128x128xf32>
      %cst_41 = arith.constant dense<0.000000e+00> : vector<8x128xf32>
      %84 = tpu.matmul %82, %83, %cst_41 {dimension_numbers = #tpu.dot_dimension_numbers<[1], [0], [0], [1], [0, 0, 1, 1], [], []>} : vector<8x128xf32>, vector<128x128xf32>, vector<8x128xf32> -> vector<8x128xf32>
      %c0_42 = arith.constant 0 : index
      %c0_43 = arith.constant 0 : index
      %85 = vector.load %arg9[%c0_42, %c0_43] : memref<1x128xf32, #tpu.memory_space<vmem>>, vector<1x128xf32>
      %86 = vector.broadcast %85 : vector<1x128xf32> to vector<8x128xf32>
      %87 = arith.addf %84, %86 : vector<8x128xf32>
      %cst_44 = arith.constant dense<0.000000e+00> : vector<128xf32>
      %88 = vector.multi_reduction <add>, %87, %cst_44 [0] : vector<8x128xf32> to vector<128xf32>
      %89 = vector.shape_cast %88 : vector<128xf32> to vector<1x128xf32>
      %cst_45 = arith.constant 8.000000e+00 : f32
      %90 = vector.broadcast %cst_45 : f32 to vector<1x128xf32>
      %91 = arith.divf %89, %90 : vector<1x128xf32>
      %92 = vector.broadcast %91 : vector<1x128xf32> to vector<8x128xf32>
      %93 = arith.subf %87, %92 : vector<8x128xf32>
      %94 = arith.mulf %93, %93 : vector<8x128xf32>
      %cst_46 = arith.constant dense<0.000000e+00> : vector<128xf32>
      %95 = vector.multi_reduction <add>, %94, %cst_46 [0] : vector<8x128xf32> to vector<128xf32>
      %96 = vector.shape_cast %95 : vector<128xf32> to vector<1x128xf32>
      %cst_47 = arith.constant 8.000000e+00 : f32
      %97 = vector.broadcast %cst_47 : f32 to vector<1x128xf32>
      %98 = arith.divf %96, %97 : vector<1x128xf32>
      %cst_48 = arith.constant 9.99999974E-6 : f32
      %99 = vector.broadcast %cst_48 : f32 to vector<1x128xf32>
      %100 = arith.addf %98, %99 : vector<1x128xf32>
      %101 = math.rsqrt %100 : vector<1x128xf32>
      %102 = vector.broadcast %101 : vector<1x128xf32> to vector<8x128xf32>
      %103 = arith.mulf %93, %102 : vector<8x128xf32>
      %c0_49 = arith.constant 0 : index
      %c0_50 = arith.constant 0 : index
      %104 = vector.load %arg10[%c0_49, %c0_50] : memref<1x128xf32, #tpu.memory_space<vmem>>, vector<1x128xf32>
      %105 = vector.broadcast %104 : vector<1x128xf32> to vector<8x128xf32>
      %106 = arith.mulf %103, %105 : vector<8x128xf32>
      %c0_51 = arith.constant 0 : index
      %c0_52 = arith.constant 0 : index
      %107 = vector.load %arg11[%c0_51, %c0_52] : memref<1x128xf32, #tpu.memory_space<vmem>>, vector<1x128xf32>
      %108 = vector.broadcast %107 : vector<1x128xf32> to vector<8x128xf32>
      %109 = arith.addf %106, %108 : vector<8x128xf32>
      %cst_53 = arith.constant 0.000000e+00 : f32
      %110 = vector.broadcast %cst_53 : f32 to vector<8x128xf32>
      %111 = arith.maximumf %109, %110 : vector<8x128xf32>
      %c0_54 = arith.constant 0 : index
      %c0_55 = arith.constant 0 : index
      %112 = vector.load %arg12[%c0_54, %c0_55] : memref<128x128xf32, #tpu.memory_space<vmem>>, vector<128x128xf32>
      %cst_56 = arith.constant dense<0.000000e+00> : vector<8x128xf32>
      %113 = tpu.matmul %111, %112, %cst_56 {dimension_numbers = #tpu.dot_dimension_numbers<[1], [0], [0], [1], [0, 0, 1, 1], [], []>} : vector<8x128xf32>, vector<128x128xf32>, vector<8x128xf32> -> vector<8x128xf32>
      %c0_57 = arith.constant 0 : index
      %c0_58 = arith.constant 0 : index
      %114 = vector.load %arg13[%c0_57, %c0_58] : memref<1x128xf32, #tpu.memory_space<vmem>>, vector<1x128xf32>
      %115 = vector.broadcast %114 : vector<1x128xf32> to vector<8x128xf32>
      %116 = arith.addf %113, %115 : vector<8x128xf32>
      %117 = arith.mulf %116, %116 : vector<8x128xf32>
      %cst_59 = arith.constant dense<0.000000e+00> : vector<8xf32>
      %118 = vector.multi_reduction <add>, %117, %cst_59 [1] : vector<8x128xf32> to vector<8xf32>
      %119 = vector.shape_cast %118 : vector<8xf32> to vector<8x1xf32>
      %cst_60 = arith.constant 1.000000e-24 : f32
      %120 = vector.broadcast %cst_60 : f32 to vector<8x1xf32>
      %121 = arith.maximumf %119, %120 : vector<8x1xf32>
      %122 = math.rsqrt %121 : vector<8x1xf32>
      %123 = vector.broadcast %122 : vector<8x1xf32> to vector<8x128xf32>
      %124 = arith.mulf %116, %123 : vector<8x128xf32>
      %c0_61 = arith.constant 0 : index
      %c0_62 = arith.constant 0 : index
      %125 = vector.load %arg14[%c0_61, %c0_62] : memref<8x128xf32, #tpu.memory_space<vmem>>, vector<8x128xf32>
      tpu.vector_store %arg14[%c0_61, %c0_62], %124 {strides = array<i32>} : memref<8x128xf32, #tpu.memory_space<vmem>>, vector<8x128xf32>,
    } else {
    }
    return
  }
  func.func @transform_0(%arg0: i32) -> (i32, i32, i32) {
    %c0_i32 = arith.constant 0 : i32
    %c0_i32_0 = arith.constant 0 : i32
    %c0_i32_1 = arith.constant 0 : i32
    return %c0_i32, %c0_i32_0, %arg0 : i32, i32, i32
  }
  func.func @transform_1(%arg0: i32) -> (i32, i32) {
    %c0_i32 = arith.constant 0 : i32
    %c0_i32_0 = arith.constant 0 : i32
    %c0_i32_1 = arith.constant 0 : i32
    return %c0_i32, %c0_i32_0 : i32, i32
  }
  func.func @transform_2(%arg0: i32) -> (i32, i32) {
    %c0_i32 = arith.constant 0 : i32
    %c0_i32_0 = arith.constant 0 : i32
    %c0_i32_1 = arith.constant 0 : i32
    return %c0_i32, %c0_i32_0 : i32, i32
  }
  func.func @transform_3(%arg0: i32) -> (i32, i32) {
    %c0_i32 = arith.constant 0 : i32
    %c0_i32_0 = arith.constant 0 : i32
    %c0_i32_1 = arith.constant 0 : i32
    return %c0_i32, %c0_i32_0 : i32, i32
  }
  func.func @transform_4(%arg0: i32) -> (i32, i32) {
    %c0_i32 = arith.constant 0 : i32
    %c0_i32_0 = arith.constant 0 : i32
    %c0_i32_1 = arith.constant 0 : i32
    return %c0_i32, %c0_i32_0 : i32, i32
  }
  func.func @transform_5(%arg0: i32) -> (i32, i32) {
    %c0_i32 = arith.constant 0 : i32
    %c0_i32_0 = arith.constant 0 : i32
    %c0_i32_1 = arith.constant 0 : i32
    return %c0_i32, %c0_i32_0 : i32, i32
  }
  func.func @transform_6(%arg0: i32) -> (i32, i32) {
    %c0_i32 = arith.constant 0 : i32
    %c0_i32_0 = arith.constant 0 : i32
    %c0_i32_1 = arith.constant 0 : i32
    return %c0_i32, %c0_i32_0 : i32, i32
  }
  func.func @transform_7(%arg0: i32) -> (i32, i32) {
    %c0_i32 = arith.constant 0 : i32
    %c0_i32_0 = arith.constant 0 : i32
    %c0_i32_1 = arith.constant 0 : i32
    return %c0_i32, %c0_i32_0 : i32, i32
  }
  func.func @transform_8(%arg0: i32) -> (i32, i32) {
    %c0_i32 = arith.constant 0 : i32
    %c0_i32_0 = arith.constant 0 : i32
    %c0_i32_1 = arith.constant 0 : i32
    return %c0_i32, %c0_i32_0 : i32, i32
  }
  func.func @transform_9(%arg0: i32) -> (i32, i32) {
    %c0_i32 = arith.constant 0 : i32
    %c0_i32_0 = arith.constant 0 : i32
    %c0_i32_1 = arith.constant 0 : i32
    return %c0_i32, %c0_i32_0 : i32, i32
  }
  func.func @transform_10(%arg0: i32) -> (i32, i32) {
    %c0_i32 = arith.constant 0 : i32
    %c0_i32_0 = arith.constant 0 : i32
    %c0_i32_1 = arith.constant 0 : i32
    return %c0_i32, %c0_i32_0 : i32, i32
  }
  func.func @transform_11(%arg0: i32) -> (i32, i32) {
    %c0_i32 = arith.constant 0 : i32
    %c0_i32_0 = arith.constant 0 : i32
    %c0_i32_1 = arith.constant 0 : i32
    return %c0_i32, %c0_i32_0 : i32, i32
  }
  func.func @transform_12(%arg0: i32) -> (i32, i32) {
    %c0_i32 = arith.constant 0 : i32
    %c0_i32_0 = arith.constant 0 : i32
    %c0_i32_1 = arith.constant 0 : i32
    return %c0_i32, %c0_i32_0 : i32, i32
  }
  func.func @transform_13(%arg0: i32) -> (i32, i32) {
    %c0_i32 = arith.constant 0 : i32
    %c0_i32_0 = arith.constant 0 : i32
    %c0_i32_1 = arith.constant 0 : i32
    return %c0_i32, %c0_i32_0 : i32, i32
  }
}

</mosaic_0001>

<bundles_post_ra>
// kernel: contrastive_forward.1
= control target key start
LH: loop header
LB: loop body
LE: loop exit
PB: predicated region body
PF: predicated region fallthrough
CT: control target
= control target key end

     0   :  { %18 = vsyncpa [#allocation5], 0  ;;  %s2779_s25 = smov 0   ;;  %s2781_s26 = smov 0   ;;  %s3488_s0 = inlined_call_operand.vmem [shape: bf16[8,4,256], index: 0, kind: input, shape index: {}]   ;;  %s3489_s1 = inlined_call_operand.vmem [shape: bf16[64,4], index: 1, kind: input, shape index: {}]   ;;  %s3490_s2 = inlined_call_operand.vmem [shape: f32[64,1], index: 2, kind: input, shape index: {}]   ;;  %s3491_s3 = inlined_call_operand.vmem [shape: f32[64,128], index: 3, kind: input, shape index: {}]   ;;  %s3492_s4 = inlined_call_operand.vmem [shape: f32[1,128], index: 4, kind: input, shape index: {}]   ;;  %s3493_s5 = inlined_call_operand.vmem [shape: f32[1,128], index: 5, kind: input, shape index: {}]   ;;  %s3494_s6 = inlined_call_operand.vmem [shape: f32[1,128], index: 6, kind: input, shape index: {}]   ;;  %s3495_s7 = inlined_call_operand.vmem [shape: f32[128,128], index: 7, kind: input, shape index: {}]   ;;  %s3496_s8 = inlined_call_operand.vmem [shape: f32[1,128], index: 8, kind: input, shape index: {}]   ;;  %s3497_s9 = inlined_call_operand.vmem [shape: f32[1,128], index: 9, kind: input, shape index: {}]   ;;  %s3498_s10 = inlined_call_operand.vmem [shape: f32[1,128], index: 10, kind: input, shape index: {}]   ;;  %s3499_s11 = inlined_call_operand.vmem [shape: f32[128,128], index: 11, kind: input, shape index: {}]   ;;  %s3500_s12 = inlined_call_operand.vmem [shape: f32[1,128], index: 12, kind: input, shape index: {}]   ;;  %s3501_s13 = inlined_call_operand.hbm [shape: f32[8,128], index: 13, kind: output, shape index: {}]  }
   0x1   :  { %s2783_s27 = smov 0  }
   0x2 LB: > { %s2795_s28 = sadd.s32 4294967295, %s2701_s27   ;;  %s2798_s29 = sadd.s32 1, %s2701_s27   ;;  %s2701_s27 = sphi %s2783_s27, %s3504_s27   ;;  %s2697_s26 = sphi %s2781_s26, %s3503_s26   ;;  %s2693_s25 = sphi %s2779_s25, %s3502_s25  }
   0x3   : > { %s28_s30 = ssub.s32 %s2701_s27, %s2798_s29  ;;  %s31_s14 = sadd.s32 1, %s2697_s26 }
   0x4   : > { %p29_p0 = scmp.eq.s32.totalorder %s28_s30, 0  ;;  %p38_p1 = scmp.ne.s32.totalorder %s2697_s26, %s2693_s25 }
   0x5   : > { %p39_p2 = scmp.eq.s32.totalorder %s2701_s27, 0  ;;  %p2226_p4 = scmp.ge.s32.totalorder %s2701_s27, 2 }
   0x6   : > { %s2807_s15 = scalar_select %p29_p0, %s2697_s26, %s31_s14  }
   0x7   : > { %p40_p3 = por %p39_p2, %p38_p1  ;;  %373 = sbr.rel (%p2226_p4) target bundleno = 23 (0x17), region = 64 }
   0xe   : > { %376 = sbr.rel (!%p40_p3) target bundleno = 23 (0x17), region = 68  ;;  %s378_s16 = sand.u32 (%p40_p3), 1, %s2697_s26  }
   0xf   : > { %s2228_s17 = sshll.u32 (%p40_p3), %s2701_s27, 1  ;;  %s2227_s18 = sshll.u32 (%p40_p3), %s378_s16, 4 }
  0x10   : > { %s382_s21 = scalar_lea.vmem (%p40_p3), %s3488_s0, %s2228_s17  ;;  %s380_s22 = scalar_lea.vmem (%p40_p3), [#allocation3], %s2227_s18 }
  0x11   : > { %v398_v0 = vld [vmem:[%s382_s21] sm:$0x3] (%p40_p3)  ;;  %v400_v1 = vld [vmem:[%s382_s21 + $0x4] sm:$0x3] (%p40_p3)  ;;  %v402_v2 = vld [vmem:[%s382_s21 + $0x8] sm:$0x3] (%p40_p3) }
  0x12   : > { %399 = vst [vmem:[%s380_s22] sm:$0x3] (%p40_p3), %v398_v0  ;;  %401 = vst [vmem:[%s380_s22 + $0x2] sm:$0x3] (%p40_p3), %v400_v1  ;;  %v404_v3 = vld [vmem:[%s382_s21 + $0xc] sm:$0x3] (%p40_p3) }
  0x13   : > { %v406_v4 = vld [vmem:[%s382_s21 + $0x10] sm:$0x3] (%p40_p3)  ;;  %403 = vst [vmem:[%s380_s22 + $0x4] sm:$0x3] (%p40_p3), %v402_v2  ;;  %405 = vst [vmem:[%s380_s22 + $0x6] sm:$0x3] (%p40_p3), %v404_v3 }
  0x14   : > { %407 = vst [vmem:[%s380_s22 + $0x8] sm:$0x3] (%p40_p3), %v406_v4  ;;  %v408_v5 = vld [vmem:[%s382_s21 + $0x14] sm:$0x3] (%p40_p3)  ;;  %v410_v6 = vld [vmem:[%s382_s21 + $0x18] sm:$0x3] (%p40_p3) }
  0x15   : > { %v412_v7 = vld [vmem:[%s382_s21 + $0x1c] sm:$0x3]  ;;  %409 = vst [vmem:[%s380_s22 + $0xa] sm:$0x3] %v408_v5  ;;  %411 = vst [vmem:[%s380_s22 + $0xc] sm:$0x3] %v410_v6 }
  0x16   : > { %413 = vst [vmem:[%s380_s22 + $0xe] sm:$0x3] %v412_v7 }
  0x17 PF: > { %p2229_p5 = scmp.ge.s32.totalorder %s2701_s27, 1  ;;  %p451_p6 = scmp.lt.s32.totalorder %s2701_s27, 3 }
  0x19   : > { %p452_p7 = pnand %p2229_p5, %p451_p6 }
  0x1a   : > { %s458_s23 = sand.u32 (!%p452_p7), 1, %s2693_s25   ;;  %p2231_p8 = scmp.ne.s32.totalorder (!%p452_p7), %s2795_s28, 0 }
  0x1b   : > { %455 = sbr.rel (%p452_p7) target bundleno = 1483 (0x5cb), region = 109  ;;  %s2230_s24 = sshll.u32 (!%p452_p7), %s458_s23, 4 }
  0x1c   : > { %s2818_s30 = scalar_lea.vmem (!%p452_p7), [#allocation3], %s2230_s24 }
  0x22   : > { %500 = sbr.rel (%p2231_p8) target bundleno = 41 (0x29), region = 117  ;;  %vm501_vm0 = vcmask (!%p2231_p8), 523264   ;;  %v2703_v8 = vmov (!%p2231_p8), 0.0  }
  0x23   : > { %502 = vst.msk [vmem:[#allocation2] sm:$0xff] (!%p2231_p8), %vm501_vm0, %v2703_v8 }
  0x29 PF: > { %v503_v9 = vld [vmem:[%s2818_s30] sm:$0x3]  ;;  %vm560_vm1 = vcmask 1041408   ;;  %v504_v10 = vld [vmem:[%s2818_s30 + $0x2] sm:$0x3]  ;;  %v2826_v11 = vld [vmem:[%s3489_s1] sm:$0xff]  }
  0x2a   : > { %2593 = vmatprep.subr.msk.bf16.mxu0 %vm560_vm1, %v503_v9  ;;  %2594 = vmatprep.subr.msk.bf16.mxu1 %vm560_vm1, %v504_v10  ;;  %v562_v12 = vsel %vm560_vm1, %v503_v9, 0  ;;  %v630_v13 = vsel %vm560_vm1, %v504_v10, 0  ;;  %vm547_vm2 = vcmask 31744   ;;  %v2835_v14 = vld [vmem:[%s3489_s1 + $0x8] sm:$0xff]   ;;  %v2844_v15 = vld [vmem:[%s3489_s1 + $0x10] sm:$0xff]   ;;  %v2704_v16 = vmov 0  }
  0x2b   : > { %2365 = vmatpush3.bf16.msra.mxu0 %v562_v12  ;;  %2375 = vmatpush3.bf16.msra.mxu1 %v630_v13  ;;  %v505_v17 = vld [vmem:[%s2818_s30 + $0x4] sm:$0x3]  ;;  %v506_v18 = vld [vmem:[%s2818_s30 + $0x6] sm:$0x3]  ;;  %v507_v21 = vld [vmem:[%s2818_s30 + $0x8] sm:$0x3] }
  0x2c   : > { %2366 = vmatprep.mubr.msk.bf16.mxu0 %vm547_vm2, %v2826_v11  ;;  %2376 = vmatprep.mubr.msk.bf16.mxu1 %vm547_vm2, %v2826_v11  ;;  %v698_v19 = vsel %vm560_vm1, %v505_v17, 0  ;;  %v766_v20 = vsel %vm560_vm1, %v506_v18, 0  ;;  %v508_v22 = vld [vmem:[%s2818_s30 + $0xa] sm:$0x3]  ;;  %v2642_v25 = vld [vmem:[%s3489_s1 + $0x18] sm:$0xff]   ;;  %v520_v27 = vld [vmem:[%s3490_s2 + $0x8] sm:$0xff] }
  0x2d   : > { %2638 = vset.pattern.permute.xlu1 %v2704_v16  ;;  %2637 = vset.pattern.permute.xlu0 %v2704_v16  ;;  %v521_v23 = vld [vmem:[%s3490_s2 + $0x10] sm:$0xff]  ;;  %v519_v24 = vld [vmem:[%s3490_s2] sm:$0xff]  ;;  %v522_v26 = vld [vmem:[%s3490_s2 + $0x18] sm:$0xff]  ;;  %v834_v30 = vsel %vm560_vm1, %v507_v21, 0  ;;  %v902_v31 = vsel %vm560_vm1, %v508_v22, 0  ;;  %vm1477_vm3 = vcmask 130112  }
  0x2e   : > { %2367 = vmatmul.mubr.msk.bf16.vlgmr.msra.gmra.mrb[0].mxu0 %vm547_vm2, %v2835_v14  ;;  %2377 = vmatmul.mubr.msk.bf16.vlgmr.msra.gmra.mrb[0].mxu1 %vm547_vm2, %v2835_v14  ;;  %v524_v28 = vld [vmem:[%s3490_s2 + $0x28] sm:$0xff]  ;;  %v523_v29 = vld [vmem:[%s3490_s2 + $0x20] sm:$0xff]  ;;  %v526_v34 = vld [vmem:[%s3490_s2 + $0x38] sm:$0xff]  ;;  %vm1484_vm4 = vcmask 195712   ;;  %vm1491_vm5 = vcmask 261312   ;;  %vm1498_vm6 = vcmask 326912  }
  0x2f   : > { %2370 = vmatprep.mubr.msk.bf16.mxu0 %vm547_vm2, %v2844_v15  ;;  %2380 = vmatprep.mubr.msk.bf16.mxu1 %vm547_vm2, %v2844_v15  ;;  %v509_v32 = vld [vmem:[%s2818_s30 + $0xc] sm:$0x3]  ;;  %v510_v33 = vld [vmem:[%s2818_s30 + $0xe] sm:$0x3]  ;;  %vm1505_vm7 = vcmask 392512   ;;  %vm1512_vm8 = vcmask 458112  }
  0x30   : > { %2595 = vmatprep.subr.msk.bf16.mxu0 %vm560_vm1, %v505_v17  ;;  %2596 = vmatprep.subr.msk.bf16.mxu1 %vm560_vm1, %v506_v18  ;;  %v525_v35 = vld [vmem:[%s3490_s2 + $0x30] sm:$0xff]  ;;  %v970_v36 = vsel %vm560_vm1, %v509_v32, 0  ;;  %v1038_v37 = vsel %vm560_vm1, %v510_v33, 0  ;;  %vm1519_vm9 = vcmask 523712   ;;  %vm1794_vm10 = vcmask 1041409   ;;  %p2268_p9 = scmp.ne.s32.totalorder %s2795_s28, 1 }
  0x31   : > { %2385 = vmatpush3.bf16.msra.mxu0 %v698_v19  ;;  %2395 = vmatpush3.bf16.msra.mxu1 %v766_v20  ;;  %vm1796_vm11 = vcmask 1042434   ;;  %vm1798_vm12 = vcmask 1043459   ;;  %vm1800_vm13 = vcmask 1044484   ;;  %vm1802_vm14 = vcmask 1045509  }
  0x32   : > { %2597 = vmatprep.subr.msk.bf16.mxu0 %vm560_vm1, %v507_v21  ;;  %2598 = vmatprep.subr.msk.bf16.mxu1 %vm560_vm1, %v508_v22  ;;  %vm1804_vm15 = vcmask 1046534   ;;  %vm1806_vm0 = vcmask 1047559  }
  0x33   : > { %1117 = vperm.xlu1 %2638, %v521_v23   ;;  %1107 = vperm.xlu0 %2637, %v519_v24  }
  0x36   : > { %2371 = vmatmul.mubr.msk.bf16.gmra.mrb[4].mxu0 %vm547_vm2, %v2642_v25  ;;  %2381 = vmatmul.mubr.msk.bf16.gmra.mrb[4].mxu1 %vm547_vm2, %v2642_v25 }
  0x37   : > { %2386 = vmatprep.mubr.msk.bf16.mxu0 %vm547_vm2, %v2826_v11  ;;  %2396 = vmatprep.mubr.msk.bf16.mxu1 %vm547_vm2, %v2826_v11 }
  0x38   : > { %1122 = vperm.xlu1 %2638, %v522_v26   ;;  %1112 = vperm.xlu0 %2637, %v520_v27  }
  0x3c   : > { %1132 = vperm.xlu1 %2638, %v524_v28   ;;  %1127 = vperm.xlu0 %2637, %v523_v29  }
  0x3e   : > { %2387 = vmatmul.mubr.msk.bf16.vlgmr.msra.gmra.mrb[8].mxu0 %vm547_vm2, %v2835_v14  ;;  %2397 = vmatmul.mubr.msk.bf16.vlgmr.msra.gmra.mrb[8].mxu1 %vm547_vm2, %v2835_v14 }
  0x3f   : > { %2390 = vmatprep.mubr.msk.bf16.mxu0 %vm547_vm2, %v2844_v15  ;;  %2400 = vmatprep.mubr.msk.bf16.mxu1 %vm547_vm2, %v2844_v15 }
  0x40   : > { %2405 = vmatpush3.bf16.msra.mxu0 %v834_v30  ;;  %2415 = vmatpush3.bf16.msra.mxu1 %v902_v31 }
  0x41   : > { %2599 = vmatprep.subr.msk.bf16.mxu0 %vm560_vm1, %v509_v32  ;;  %2600 = vmatprep.subr.msk.bf16.mxu1 %vm560_vm1, %v510_v33  ;;  %vm1810_vm1 = vcmask 523264  }
  0x42   : > { %1142 = vperm.xlu1 %2638, %v526_v34   ;;  %1137 = vperm.xlu0 %2637, %v525_v35  }
  0x46   : > { %2391 = vmatmul.mubr.msk.bf16.gmra.mrb[12].mxu0 %vm547_vm2, %v2642_v25  ;;  %2401 = vmatmul.mubr.msk.bf16.gmra.mrb[12].mxu1 %vm547_vm2, %v2642_v25 }
  0x47   : > { %2406 = vmatprep.mubr.msk.bf16.mxu0 %vm547_vm2, %v2826_v11  ;;  %2416 = vmatprep.mubr.msk.bf16.mxu1 %vm547_vm2, %v2826_v11 }
  0x4e   : > { %2407 = vmatmul.mubr.msk.bf16.vlgmr.msra.gmra.mrb[16].mxu0 %vm547_vm2, %v2835_v14  ;;  %2417 = vmatmul.mubr.msk.bf16.vlgmr.msra.gmra.mrb[16].mxu1 %vm547_vm2, %v2835_v14 }
  0x4f   : > { %2410 = vmatprep.mubr.msk.bf16.mxu0 %vm547_vm2, %v2844_v15  ;;  %2420 = vmatprep.mubr.msk.bf16.mxu1 %vm547_vm2, %v2844_v15 }
  0x50   : > { %2425 = vmatpush3.bf16.msra.mxu0 %v970_v36  ;;  %2435 = vmatpush3.bf16.msra.mxu1 %v1038_v37 }
  0x56   : > { %2411 = vmatmul.mubr.msk.bf16.gmra.mrb[20].mxu0 %vm547_vm2, %v2642_v25  ;;  %2421 = vmatmul.mubr.msk.bf16.gmra.mrb[20].mxu1 %vm547_vm2, %v2642_v25 }
  0x57   : > { %2426 = vmatprep.mubr.msk.bf16.mxu0 %vm547_vm2, %v2826_v11  ;;  %2436 = vmatprep.mubr.msk.bf16.mxu1 %vm547_vm2, %v2826_v11 }
  0x5e   : > { %2427 = vmatmul.mubr.msk.bf16.vlgmr.msra.gmra.mrb[24].mxu0 %vm547_vm2, %v2835_v14  ;;  %2437 = vmatmul.mubr.msk.bf16.vlgmr.msra.gmra.mrb[24].mxu1 %vm547_vm2, %v2835_v14 }
  0x5f   : > { %2430 = vmatprep.mubr.msk.bf16.mxu0 %vm547_vm2, %v2844_v15  ;;  %2440 = vmatprep.mubr.msk.bf16.mxu1 %vm547_vm2, %v2844_v15 }
  0x66   : > { %2431 = vmatmul.mubr.msk.bf16.gmra.mrb[28].mxu0 %vm547_vm2, %v2642_v25  ;;  %2441 = vmatmul.mubr.msk.bf16.gmra.mrb[28].mxu1 %vm547_vm2, %v2642_v25  ;;  %vm2706_vm2 = vmmov (!%p2268_p9), 0  }
  0xb2   : > { %v2943_v38 = vpop.permute.xlu0 %1107  ;;  %v2945_v39 = vpop.permute.xlu1 %1117 }
  0xb7   : > { %v2947_v40 = vpop.permute.xlu0 %1112  ;;  %v2949_v41 = vpop.permute.xlu1 %1122 }
  0xbb   : > { %v2951_v42 = vpop.permute.xlu0 %1127  ;;  %v2957_v58 = vpop.permute.xlu1 %1132 }
  0xc1   : > { %v2961_v62 = vpop.permute.xlu0 %1137  ;;  %v2965_v11 = vpop.permute.xlu1 %1142 }
 0x101   : > { %v2368_v43 = vpop.f32.mrb[0].mxu0  ;;  %v2378_v44 = vpop.f32.mrb[0].mxu1 }
 0x102   : > { %v1147_v45 = vadd.f32 %v2368_v43, %v2945_v39  ;;  %v1155_v46 = vadd.f32 %v2378_v44, %v2945_v39  ;;  %v598_v47 = vpop.f32.mrb[1].mxu0  ;;  %v666_v48 = vpop.f32.mrb[1].mxu1 }
 0x103   : > { %v1153_v49 = vadd.f32 %v2943_v38, %v666_v48  ;;  %v2369_v50 = vpop.f32.mrb[2].mxu0  ;;  %v2379_v51 = vpop.f32.mrb[2].mxu1  ;;  %v1145_v54 = vadd.f32 %v2943_v38, %v598_v47 }
 0x104   : > { %v1211_v52 = vmax.f32 %v1147_v45, 0.0  ;;  %v1219_v53 = vmax.f32 %v1155_v46, 0.0  ;;  %v601_v55 = vpop.f32.mrb[3].mxu0  ;;  %v669_v56 = vpop.f32.mrb[3].mxu1  ;;  %v1148_v60 = vadd.f32 %v2369_v50, %v2949_v41  ;;  %v1156_v6 = vadd.f32 %v2379_v51, %v2949_v41 }
 0x105   : > { %v1217_v57 = vmax.f32 %v1153_v49, 0.0  ;;  %v1209_v59 = vmax.f32 %v1145_v54, 0.0  ;;  %v1146_v61 = vadd.f32 %v2947_v40, %v601_v55  ;;  %v1154_v13 = vadd.f32 %v2947_v40, %v669_v56 }
 0x106   : > { %1294 = vadd.xlane.f32.xlu1 %v1219_v53  ;;  %1278 = vadd.xlane.f32.xlu0 %v1211_v52  ;;  %v1212_v5 = vmax.f32 %v1148_v60, 0.0  ;;  %v1220_v12 = vmax.f32 %v1156_v6, 0.0 }
 0x107   : > { %v1210_v7 = vmax.f32 %v1146_v61, 0.0  ;;  %v1218_v22 = vmax.f32 %v1154_v13, 0.0 }
 0x109   : > { %v2372_v63 = vpop.f32.mrb[4].mxu0  ;;  %v2382_v0 = vpop.f32.mrb[4].mxu1 }
 0x10a   : > { %1290 = vadd.xlane.f32.xlu1 %v1217_v57  ;;  %v682_v1 = vpop.f32.mrb[5].mxu1  ;;  %1274 = vadd.xlane.f32.xlu0 %v1209_v59  ;;  %v614_v2 = vpop.f32.mrb[5].mxu0  ;;  %v1151_v8 = vadd.f32 %v2372_v63, %v2961_v62  ;;  %v1159_v15 = vadd.f32 %v2382_v0, %v2961_v62 }
 0x10b   : > { %v2373_v3 = vpop.f32.mrb[6].mxu0  ;;  %v2383_v4 = vpop.f32.mrb[6].mxu1  ;;  %v1149_v24 = vadd.f32 %v2951_v42, %v614_v2  ;;  %v1157_v28 = vadd.f32 %v2951_v42, %v682_v1 }
 0x10c   : > { %v617_v9 = vpop.f32.mrb[7].mxu0  ;;  %v685_v10 = vpop.f32.mrb[7].mxu1  ;;  %v1215_v14 = vmax.f32 %v1151_v8, 0.0  ;;  %v1223_v23 = vmax.f32 %v1159_v15, 0.0  ;;  %v1152_v25 = vadd.f32 %v2373_v3, %v2965_v11  ;;  %v1160_v31 = vadd.f32 %v2383_v4, %v2965_v11 }
 0x10d   : > { %v1213_v29 = vmax.f32 %v1149_v24, 0.0  ;;  %v1221_v43 = vmax.f32 %v1157_v28, 0.0  ;;  %v1150_v45 = vadd.f32 %v2957_v58, %v617_v9  ;;  %v1158_v50 = vadd.f32 %v2957_v58, %v685_v10 }
 0x10e   : > { %1280 = vadd.xlane.f32.xlu0 %v1212_v5  ;;  %1276 = vadd.xlane.f32.xlu1 %v1210_v7  ;;  %v1216_v30 = vmax.f32 %v1152_v25, 0.0  ;;  %v1224_v44 = vmax.f32 %v1160_v31, 0.0 }
 0x10f   : > { %v1214_v49 = vmax.f32 %v1150_v45, 0.0  ;;  %v1222_v60 = vmax.f32 %v1158_v50, 0.0 }
 0x111   : > { %v2388_v16 = vpop.f32.mrb[8].mxu0  ;;  %v2398_v17 = vpop.f32.mrb[8].mxu1 }
 0x112   : > { %v802_v18 = vpop.f32.mrb[9].mxu1  ;;  %1296 = vadd.xlane.f32.xlu0 %v1220_v12  ;;  %1286 = vadd.xlane.f32.xlu1 %v1215_v14  ;;  %v734_v19 = vpop.f32.mrb[9].mxu0  ;;  %v1163_v46 = vadd.f32 %v2388_v16, %v2945_v39  ;;  %v1171_v52 = vadd.f32 %v2398_v17, %v2945_v39 }
 0x113   : > { %v2389_v20 = vpop.f32.mrb[10].mxu0  ;;  %v2399_v21 = vpop.f32.mrb[10].mxu1  ;;  %v1161_v63 = vadd.f32 %v2943_v38, %v734_v19  ;;  %v1169_v3 = vadd.f32 %v2943_v38, %v802_v18 }
 0x114   : > { %v737_v26 = vpop.f32.mrb[11].mxu0  ;;  %v805_v27 = vpop.f32.mrb[11].mxu1  ;;  %v1227_v51 = vmax.f32 %v1163_v46, 0.0  ;;  %v1235_v61 = vmax.f32 %v1171_v52, 0.0  ;;  %v1164_v0 = vadd.f32 %v2389_v20, %v2949_v41  ;;  %v1172_v15 = vadd.f32 %v2399_v21, %v2949_v41 }
 0x115   : > { %v1225_v4 = vmax.f32 %v1161_v63, 0.0  ;;  %v1162_v6 = vadd.f32 %v2947_v40, %v737_v26  ;;  %v1233_v14 = vmax.f32 %v1169_v3, 0.0  ;;  %v1170_v17 = vadd.f32 %v2947_v40, %v805_v27 }
 0x116   : > { %1292 = vadd.xlane.f32.xlu0 %v1218_v22  ;;  %1302 = vadd.xlane.f32.xlu1 %v1223_v23  ;;  %v1228_v5 = vmax.f32 %v1164_v0, 0.0  ;;  %v1236_v20 = vmax.f32 %v1172_v15, 0.0 }
 0x117   : > { %v1226_v16 = vmax.f32 %v1162_v6, 0.0  ;;  %v1234_v22 = vmax.f32 %v1170_v17, 0.0 }
 0x119   : > { %v2392_v32 = vpop.f32.mrb[12].mxu0  ;;  %v2973_v33 = vpop.f32.mrb[12].mxu1 }
 0x11a   : > { %v2975_v34 = vpop.f32.mrb[13].mxu1  ;;  %1282 = vadd.xlane.f32.xlu1 %v1213_v29  ;;  %1288 = vadd.xlane.f32.xlu0 %v1216_v30  ;;  %v750_v35 = vpop.f32.mrb[13].mxu0  ;;  %v1167_v23 = vadd.f32 %v2392_v32, %v2961_v62  ;;  %v1175_v31 = vadd.f32 %v2973_v33, %v2961_v62 }
 0x11b   : > { %v2977_v36 = vpop.f32.mrb[14].mxu0  ;;  %v2979_v37 = vpop.f32.mrb[14].mxu1  ;;  %v1165_v24 = vadd.f32 %v2951_v42, %v750_v35  ;;  %v1173_v32 = vadd.f32 %v2951_v42, %v2975_v34 }
 0x11c   : > { %v2983_v47 = vpop.f32.mrb[15].mxu0  ;;  %v2985_v48 = vpop.f32.mrb[15].mxu1  ;;  %v1231_v30 = vmax.f32 %v1167_v23, 0.0  ;;  %v1239_v45 = vmax.f32 %v1175_v31, 0.0 }
 0x11d   : > { %v1229_v35 = vmax.f32 %v1165_v24, 0.0  ;;  %v1237_v46 = vmax.f32 %v1173_v32, 0.0  ;;  %v1166_v50 = vadd.f32 %v2957_v58, %v2983_v47  ;;  %v1174_v6 = vadd.f32 %v2957_v58, %v2985_v48 }
 0x11e   : > { %1298 = vadd.xlane.f32.xlu1 %v1221_v43  ;;  %1304 = vadd.xlane.f32.xlu0 %v1224_v44 }
 0x11f   : > { %v1230_v0 = vmax.f32 %v1166_v50, 0.0 }
 0x121   : > { %v2989_v53 = vpop.f32.mrb[16].mxu0  ;;  %v2991_v54 = vpop.f32.mrb[16].mxu1 }
 0x122   : > { %v2993_v55 = vpop.f32.mrb[17].mxu1  ;;  %1284 = vadd.xlane.f32.xlu0 %v1214_v49  ;;  %1310 = vadd.xlane.f32.xlu1 %v1227_v51  ;;  %v2995_v56 = vpop.f32.mrb[17].mxu0  ;;  %v1168_v49 = vadd.f32 %v2977_v36, %v2965_v11  ;;  %v1176_v36 = vadd.f32 %v2979_v37, %v2965_v11  ;;  %v1238_v37 = vmax.f32 %v1174_v6, 0.0  ;;  %v1187_v48 = vadd.f32 %v2991_v54, %v2945_v39 }
 0x123   : > { %v2997_v57 = vpop.f32.mrb[18].mxu0  ;;  %v2999_v59 = vpop.f32.mrb[18].mxu1  ;;  %v1185_v47 = vadd.f32 %v2943_v38, %v2993_v55  ;;  %v1179_v55 = vadd.f32 %v2989_v53, %v2945_v39  ;;  %v1177_v53 = vadd.f32 %v2943_v38, %v2995_v56 }
 0x124   : > { %v3003_v1 = vpop.f32.mrb[19].mxu0  ;;  %v3005_v2 = vpop.f32.mrb[19].mxu1  ;;  %v1232_v63 = vmax.f32 %v1168_v49, 0.0  ;;  %v1180_v15 = vadd.f32 %v2997_v57, %v2949_v41  ;;  %v1251_v23 = vmax.f32 %v1187_v48, 0.0  ;;  %v1188_v54 = vadd.f32 %v2999_v59, %v2949_v41 }
 0x125   : > { %v1178_v17 = vadd.f32 %v2947_v40, %v3003_v1  ;;  %v1186_v56 = vadd.f32 %v2947_v40, %v3005_v2 }
 0x126   : > { %1300 = vadd.xlane.f32.xlu0 %v1222_v60  ;;  %1326 = vadd.xlane.f32.xlu1 %v1235_v61  ;;  %v1252_v32 = vmax.f32 %v1188_v54, 0.0 }
 0x129   : > { %v3009_v7 = vpop.f32.mrb[20].mxu0  ;;  %v3011_v8 = vpop.f32.mrb[20].mxu1 }
 0x12a   : > { %v3013_v9 = vpop.f32.mrb[21].mxu1  ;;  %1306 = vadd.xlane.f32.xlu1 %v1225_v4  ;;  %1312 = vadd.xlane.f32.xlu0 %v1228_v5  ;;  %v3015_v10 = vpop.f32.mrb[21].mxu0  ;;  %v1240_v5 = vmax.f32 %v1176_v36, 0.0  ;;  %v1183_v57 = vadd.f32 %v3009_v7, %v2961_v62  ;;  %v1191_v59 = vadd.f32 %v3011_v8, %v2961_v62 }
 0x12b   : > { %v3017_v12 = vpop.f32.mrb[22].mxu0  ;;  %v3019_v13 = vpop.f32.mrb[22].mxu1  ;;  %v1181_v1 = vadd.f32 %v2951_v42, %v3015_v10  ;;  %v1189_v31 = vadd.f32 %v2951_v42, %v3013_v9 }
 0x12c   : > { %v3023_v18 = vpop.f32.mrb[23].mxu0  ;;  %v3025_v19 = vpop.f32.mrb[23].mxu1  ;;  %v1247_v24 = vmax.f32 %v1183_v57, 0.0  ;;  %v1184_v10 = vadd.f32 %v3017_v12, %v2965_v11  ;;  %v1192_v9 = vadd.f32 %v3019_v13, %v2965_v11  ;;  %v1255_v49 = vmax.f32 %v1191_v59, 0.0 }
 0x12d   : > { %v1245_v7 = vmax.f32 %v1181_v1, 0.0  ;;  %v1182_v2 = vadd.f32 %v2957_v58, %v3023_v18  ;;  %v1190_v8 = vadd.f32 %v2957_v58, %v3025_v19 }
 0x12e   : > { %1322 = vadd.xlane.f32.xlu1 %v1233_v14  ;;  %1308 = vadd.xlane.f32.xlu0 %v1226_v16  ;;  %v1249_v14 = vmax.f32 %v1185_v47, 0.0  ;;  %v1244_v16 = vmax.f32 %v1180_v15, 0.0  ;;  %v1256_v50 = vmax.f32 %v1192_v9, 0.0 }
 0x131   : > { %v3029_v25 = vpop.f32.mrb[24].mxu0  ;;  %v3031_v26 = vpop.f32.mrb[24].mxu1 }
 0x132   : > { %v3033_v21 = vpop.f32.mrb[25].mxu1  ;;  %1328 = vadd.xlane.f32.xlu1 %v1236_v20  ;;  %1324 = vadd.xlane.f32.xlu0 %v1234_v22  ;;  %v3035_v27 = vpop.f32.mrb[25].mxu0  ;;  %v1243_v20 = vmax.f32 %v1179_v55, 0.0  ;;  %v1242_v22 = vmax.f32 %v1178_v17, 0.0  ;;  %v1195_v12 = vadd.f32 %v3029_v25, %v2945_v39  ;;  %v1203_v13 = vadd.f32 %v3031_v26, %v2945_v39 }
 0x133   : > { %v3037_v28 = vpop.f32.mrb[26].mxu0  ;;  %v3039_v29 = vpop.f32.mrb[26].mxu1  ;;  %v1201_v18 = vadd.f32 %v2943_v38, %v3033_v21  ;;  %v1193_v25 = vadd.f32 %v2943_v38, %v3035_v27 }
 0x134   : > { %v3045_v43 = vpop.f32.mrb[27].mxu0  ;;  %v3047_v44 = vpop.f32.mrb[27].mxu1  ;;  %v1259_v36 = vmax.f32 %v1195_v12, 0.0  ;;  %v1267_v47 = vmax.f32 %v1203_v13, 0.0  ;;  %v1196_v19 = vadd.f32 %v3037_v28, %v2949_v41 }
 0x135   : > { %v1257_v6 = vmax.f32 %v1193_v25, 0.0  ;;  %v1202_v39 = vadd.f32 %v2947_v40, %v3047_v44  ;;  %v1194_v15 = vadd.f32 %v2947_v40, %v3045_v43 }
 0x136   : > { %1318 = vadd.xlane.f32.xlu1 %v1231_v30  ;;  %1314 = vadd.xlane.f32.xlu0 %v1229_v35  ;;  %v1241_v30 = vmax.f32 %v1177_v53, 0.0  ;;  %v1253_v35 = vmax.f32 %v1189_v31, 0.0  ;;  %v1260_v26 = vmax.f32 %v1196_v19, 0.0 }
 0x137   : > { %v1266_v21 = vmax.f32 %v1202_v39, 0.0 }
 0x139   : > { %v3053_v51 = vpop.f32.mrb[28].mxu0  ;;  %v3055_v33 = vpop.f32.mrb[28].mxu1 }
 0x13a   : > { %v3057_v34 = vpop.f32.mrb[29].mxu1  ;;  %1334 = vadd.xlane.f32.xlu1 %v1239_v45  ;;  %1330 = vadd.xlane.f32.xlu0 %v1237_v46  ;;  %v3059_v52 = vpop.f32.mrb[29].mxu0  ;;  %v1250_v45 = vmax.f32 %v1186_v56, 0.0  ;;  %v1248_v46 = vmax.f32 %v1184_v10, 0.0  ;;  %v1207_v40 = vadd.f32 %v3055_v33, %v2961_v62 }
 0x13b   : > { %v3061_v60 = vpop.f32.mrb[30].mxu0  ;;  %v3063_v61 = vpop.f32.mrb[30].mxu1  ;;  %v1197_v38 = vadd.f32 %v2951_v42, %v3059_v52  ;;  %v1205_v43 = vadd.f32 %v2951_v42, %v3057_v34 }
 0x13c   : > { %v3069_v3 = vpop.f32.mrb[31].mxu0  ;;  %v3071_v4 = vpop.f32.mrb[31].mxu1 }
 0x13d   : > { %v1261_v28 = vmax.f32 %v1197_v38, 0.0  ;;  %v1198_v44 = vadd.f32 %v2957_v58, %v3069_v3  ;;  %v1206_v52 = vadd.f32 %v2957_v58, %v3071_v4  ;;  %v1269_v17 = vmax.f32 %v1205_v43, 0.0 }
 0x13e   : > { %1320 = vadd.xlane.f32.xlu0 %v1232_v63  ;;  %1316 = vadd.xlane.f32.xlu1 %v1230_v0  ;;  %v1246_v63 = vmax.f32 %v1182_v2, 0.0  ;;  %v1254_v0 = vmax.f32 %v1190_v8, 0.0  ;;  %v1208_v4 = vadd.f32 %v3063_v61, %v2965_v11 }
 0x13f   : > { %v1270_v3 = vmax.f32 %v1206_v52, 0.0 }
 0x142   : > { %1336 = vadd.xlane.f32.xlu0 %v1240_v5  ;;  %1354 = vadd.xlane.f32.xlu1 %v1249_v14  ;;  %v1265_v5 = vmax.f32 %v1201_v18, 0.0  ;;  %v1204_v14 = vadd.f32 %v3039_v29, %v2949_v41  ;;  %v1199_v41 = vadd.f32 %v3053_v51, %v2961_v62  ;;  %v1262_v29 = vmax.f32 %v1198_v44, 0.0 }
 0x143   : > { %v1200_v51 = vadd.f32 %v3061_v60, %v2965_v11  ;;  %v1466_v62 = vlaneseq }
 0x144   : > { %v1268_v27 = vmax.f32 %v1204_v14, 0.0  ;;  %v1263_v55 = vmax.f32 %v1199_v41, 0.0 }
 0x145   : > { %v1264_v58 = vmax.f32 %v1200_v51, 0.0  ;;  %v1467_v33 = vand.u32 127, %v1466_v62 }
 0x146   : > { %1332 = vadd.xlane.f32.xlu0 %v1238_v37  ;;  %1344 = vadd.xlane.f32.xlu1 %v1244_v16  ;;  %v1258_v37 = vmax.f32 %v1194_v15, 0.0  ;;  %v1271_v16 = vmax.f32 %v1207_v40, 0.0 }
 0x147   : > { %v1472_v48 = vadd.s32 4294967288, %v1467_v33  ;;  %v1479_v57 = vadd.s32 4294967280, %v1467_v33  ;;  %v1493_v9 = vadd.s32 4294967264, %v1467_v33  ;;  %v1507_v19 = vadd.s32 4294967248, %v1467_v33 }
 0x14a   : > { %1342 = vadd.xlane.f32.xlu0 %v1243_v20  ;;  %1340 = vadd.xlane.f32.xlu1 %v1242_v22  ;;  %v1272_v20 = vmax.f32 %v1208_v4, 0.0  ;;  %v1469_v22 = vshrl.u32 %v1466_v62, 7 }
 0x14c   : > { %v3137_v60 = vsub.s32 %v1467_v33, %v1469_v22  ;;  %v3139_v1 = vsub.s32 %v1472_v48, %v1469_v22  ;;  %v3166_v15 = vsub.s32 %v1507_v19, %v1469_v22 }
 0x14e   : > { %1358 = vadd.xlane.f32.xlu0 %v1251_v23  ;;  %1350 = vadd.xlane.f32.xlu1 %v1247_v24  ;;  %v1486_v23 = vadd.s32 4294967272, %v1467_v33 }
 0x150   : > { %v3143_v11 = vsub.s32 %v1486_v23, %v1469_v22 }
 0x152   : > { %1338 = vadd.xlane.f32.xlu0 %v1241_v30  ;;  %1346 = vadd.xlane.f32.xlu1 %v1245_v7  ;;  %v3141_v30 = vsub.s32 %v1479_v57, %v1469_v22 }
 0x156   : > { %1360 = vadd.xlane.f32.xlu0 %v1252_v32  ;;  %1362 = vadd.xlane.f32.xlu1 %v1253_v35 }
 0x15a   : > { %1356 = vadd.xlane.f32.xlu0 %v1250_v45  ;;  %1352 = vadd.xlane.f32.xlu1 %v1248_v46 }
 0x15e   : > { %1366 = vadd.xlane.f32.xlu0 %v1255_v49  ;;  %1368 = vadd.xlane.f32.xlu1 %v1256_v50 }
 0x162   : > { %1348 = vadd.xlane.f32.xlu0 %v1246_v63  ;;  %1374 = vadd.xlane.f32.xlu1 %v1259_v36  ;;  %v3154_v63 = vsub.s32 %v1493_v9, %v1469_v22 }
 0x166   : > { %1364 = vadd.xlane.f32.xlu0 %v1254_v0  ;;  %1390 = vadd.xlane.f32.xlu1 %v1267_v47 }
 0x16a   : > { %1386 = vadd.xlane.f32.xlu0 %v1265_v5  ;;  %1370 = vadd.xlane.f32.xlu1 %v1257_v6  ;;  %v1500_v6 = vadd.s32 4294967256, %v1467_v33 }
 0x16e   : > { %1388 = vadd.xlane.f32.xlu1 %v1266_v21  ;;  %1376 = vadd.xlane.f32.xlu0 %v1260_v26  ;;  %v1514_v26 = vadd.s32 4294967240, %v1467_v33 }
 0x172   : > { %1392 = vadd.xlane.f32.xlu0 %v1268_v27  ;;  %1378 = vadd.xlane.f32.xlu1 %v1261_v28  ;;  %v3164_v27 = vsub.s32 %v1500_v6, %v1469_v22  ;;  %v3168_v28 = vsub.s32 %v1514_v26, %v1469_v22 }
 0x176   : > { %1372 = vadd.xlane.f32.xlu0 %v1258_v37  ;;  %1380 = vadd.xlane.f32.xlu1 %v1262_v29 }
 0x17a   : > { %1382 = vadd.xlane.f32.xlu0 %v1263_v55  ;;  %1396 = vadd.xlane.f32.xlu1 %v1270_v3 }
 0x17e   : > { %1394 = vadd.xlane.f32.xlu0 %v1269_v17  ;;  %1398 = vadd.xlane.f32.xlu1 %v1271_v16 }
 0x182   : > { %1384 = vadd.xlane.f32.xlu0 %v1264_v58 }
 0x186   : > { %1400 = vadd.xlane.f32.xlu0 %v1272_v20 }
 0x193   : > { %v1295_v42 = vpop.xlane.xlu1 %1294  ;;  %v1279_v34 = vpop.xlane.xlu0 %1278 }
 0x194   : > { %v1483_v32 = vrot.slane %v1279_v34, %v3141_v30  ;;  %v1533_v8 = vrot.slane %v1295_v42, %v3141_v30 }
 0x197   : > { %v1291_v53 = vpop.xlane.xlu1 %1290  ;;  %v1275_v24 = vpop.xlane.xlu0 %1274 }
 0x198   : > { %v1471_v31 = vrot.slane %v1275_v24, %v3137_v60  ;;  %v1524_v2 = vrot.slane %v1291_v53, %v3137_v60 }
 0x19b   : > { %v1281_v61 = vpop.xlane.xlu0 %1280  ;;  %v1277_v54 = vpop.xlane.xlu1 %1276 }
 0x19c   : > { %v1476_v7 = vrot.slane %v1277_v54, %v3139_v1  ;;  %v1490_v56 = vrot.slane %v1281_v61, %v3143_v11 }
 0x19e   : > { %v1478_v35 = vsel %vm1477_vm3, %v1476_v7, %v1471_v31 }
 0x19f   : > { %v1485_v10 = vsel %vm1484_vm4, %v1483_v32, %v1478_v35  ;;  %v1297_v45 = vpop.xlane.xlu0 %1296  ;;  %v1287_v59 = vpop.xlane.xlu1 %1286 }
 0x1a0   : > { %v1492_v46 = vsel %vm1491_vm5, %v1490_v56, %v1485_v10  ;;  %v1538_v36 = vrot.slane %v1297_v45, %v3143_v11  ;;  %v1511_v52 = vrot.slane %v1287_v59, %v3166_v15 }
 0x1a3   : > { %v1293_v49 = vpop.xlane.xlu0 %1292  ;;  %v1303_v50 = vpop.xlane.xlu1 %1302 }
 0x1a4   : > { %v1528_v12 = vrot.slane %v1293_v49, %v3139_v1  ;;  %v1553_v58 = vrot.slane %v1303_v50, %v3166_v15 }
 0x1a6   : > { %v1529_v13 = vsel %vm1477_vm3, %v1528_v12, %v1524_v2 }
 0x1a7   : > { %v1534_v0 = vsel %vm1484_vm4, %v1533_v8, %v1529_v13  ;;  %v1283_v47 = vpop.xlane.xlu1 %1282  ;;  %v1289_v18 = vpop.xlane.xlu0 %1288 }
 0x1a8   : > { %v1497_v25 = vrot.slane %v1283_v47, %v3154_v63  ;;  %v1539_v5 = vsel %vm1491_vm5, %v1538_v36, %v1534_v0  ;;  %v1518_v55 = vrot.slane %v1289_v18, %v3168_v28 }
 0x1aa   : > { %v1499_v39 = vsel %vm1498_vm6, %v1497_v25, %v1492_v46 }
 0x1ab   : > { %v1299_v14 = vpop.xlane.xlu1 %1298  ;;  %v1305_v21 = vpop.xlane.xlu0 %1304 }
 0x1ac   : > { %v1543_v38 = vrot.slane %v1299_v14, %v3154_v63  ;;  %v1558_v4 = vrot.slane %v1305_v21, %v3168_v28 }
 0x1ae   : > { %v1544_v44 = vsel %vm1498_vm6, %v1543_v38, %v1539_v5 }
 0x1af   : > { %v1285_v37 = vpop.xlane.xlu0 %1284  ;;  %v1311_v41 = vpop.xlane.xlu1 %1310 }
 0x1b0   : > { %v1504_v29 = vrot.slane %v1285_v37, %v3164_v27  ;;  %v1572_v24 = vrot.slane %v1311_v41, %v3141_v30 }
 0x1b2   : > { %v1506_v40 = vsel %vm1505_vm7, %v1504_v29, %v1499_v39 }
 0x1b3   : > { %v1513_v43 = vsel %vm1512_vm8, %v1511_v52, %v1506_v40  ;;  %v1301_v3 = vpop.xlane.xlu0 %1300  ;;  %v1327_v16 = vpop.xlane.xlu1 %1326 }
 0x1b4   : > { %v1520_v17 = vsel %vm1519_vm9, %v1518_v55, %v1513_v43  ;;  %v1548_v51 = vrot.slane %v1301_v3, %v3164_v27  ;;  %v1611_v45 = vrot.slane %v1327_v16, %v3141_v30 }
 0x1b6   : > { %v1549_v20 = vsel %vm1505_vm7, %v1548_v51, %v1544_v44 }
 0x1b7   : > { %v1554_v62 = vsel %vm1512_vm8, %v1553_v58, %v1549_v20  ;;  %v1307_v33 = vpop.xlane.xlu1 %1306  ;;  %v1313_v42 = vpop.xlane.xlu0 %1312 }
 0x1b8   : > { %v1559_v34 = vsel %vm1519_vm9, %v1558_v4, %v1554_v62  ;;  %v1563_v23 = vrot.slane %v1307_v33, %v3137_v60  ;;  %v1577_v61 = vrot.slane %v1313_v42, %v3143_v11 }
 0x1b9   : > { %v1795_v48 = vsel %vm1794_vm10, %v1559_v34, %v1520_v17 }
 0x1bb   : > { %v1323_v22 = vpop.xlane.xlu1 %1322  ;;  %v1309_v57 = vpop.xlane.xlu0 %1308 }
 0x1bc   : > { %v1567_v53 = vrot.slane %v1309_v57, %v3139_v1  ;;  %v1602_v56 = vrot.slane %v1323_v22, %v3137_v60 }
 0x1be   : > { %v1568_v54 = vsel %vm1477_vm3, %v1567_v53, %v1563_v23 }
 0x1bf   : > { %v1573_v31 = vsel %vm1484_vm4, %v1572_v24, %v1568_v54  ;;  %v1329_v7 = vpop.xlane.xlu1 %1328  ;;  %v1325_v32 = vpop.xlane.xlu0 %1324 }
 0x1c0   : > { %v1606_v35 = vrot.slane %v1325_v32, %v3139_v1  ;;  %v1578_v10 = vsel %vm1491_vm5, %v1577_v61, %v1573_v31  ;;  %v1616_v59 = vrot.slane %v1329_v7, %v3143_v11 }
 0x1c2   : > { %v1607_v46 = vsel %vm1477_vm3, %v1606_v35, %v1602_v56 }
 0x1c3   : > { %v1612_v9 = vsel %vm1484_vm4, %v1611_v45, %v1607_v46  ;;  %v1319_v49 = vpop.xlane.xlu1 %1318  ;;  %v1315_v50 = vpop.xlane.xlu0 %1314 }
 0x1c4   : > { %v1582_v2 = vrot.slane %v1315_v50, %v3154_v63  ;;  %v1617_v12 = vsel %vm1491_vm5, %v1616_v59, %v1612_v9  ;;  %v1592_v6 = vrot.slane %v1319_v49, %v3166_v15 }
 0x1c6   : > { %v1583_v8 = vsel %vm1498_vm6, %v1582_v2, %v1578_v10 }
 0x1c7   : > { %v1335_v36 = vpop.xlane.xlu1 %1334  ;;  %v1331_v13 = vpop.xlane.xlu0 %1330 }
 0x1c8   : > { %v1621_v0 = vrot.slane %v1331_v13, %v3154_v63  ;;  %v1631_v52 = vrot.slane %v1335_v36, %v3166_v15 }
 0x1ca   : > { %v1622_v47 = vsel %vm1498_vm6, %v1621_v0, %v1617_v12 }
 0x1cb   : > { %v1321_v18 = vpop.xlane.xlu0 %1320  ;;  %v1317_v25 = vpop.xlane.xlu1 %1316 }
 0x1cc   : > { %v1587_v5 = vrot.slane %v1317_v25, %v3164_v27  ;;  %v1597_v19 = vrot.slane %v1321_v18, %v3168_v28 }
 0x1ce   : > { %v1588_v39 = vsel %vm1505_vm7, %v1587_v5, %v1583_v8 }
 0x1cf   : > { %v1593_v26 = vsel %vm1512_vm8, %v1592_v6, %v1588_v39  ;;  %v1337_v14 = vpop.xlane.xlu0 %1336  ;;  %v1355_v21 = vpop.xlane.xlu1 %1354 }
 0x1d0   : > { %v1598_v38 = vsel %vm1519_vm9, %v1597_v19, %v1593_v26  ;;  %v1636_v55 = vrot.slane %v1337_v14, %v3168_v28  ;;  %v1680_v46 = vrot.slane %v1355_v21, %v3137_v60 }
 0x1d1   : > { %v1797_v44 = vsel %vm1796_vm11, %v1598_v38, %v1795_v48 }
 0x1d3   : > { %v1333_v37 = vpop.xlane.xlu0 %1332  ;;  %v1345_v41 = vpop.xlane.xlu1 %1344 }
 0x1d4   : > { %v1626_v29 = vrot.slane %v1333_v37, %v3164_v27 }
 0x1d6   : > { %v1627_v40 = vsel %vm1505_vm7, %v1626_v29, %v1622_v47  ;;  %v1655_v47 = vrot.slane %v1345_v41, %v3143_v11 }
 0x1d7   : > { %v1632_v43 = vsel %vm1512_vm8, %v1631_v52, %v1627_v40  ;;  %v1343_v3 = vpop.xlane.xlu0 %1342  ;;  %v1341_v16 = vpop.xlane.xlu1 %1340 }
 0x1d8   : > { %v1637_v17 = vsel %vm1519_vm9, %v1636_v55, %v1632_v43  ;;  %v1645_v10 = vrot.slane %v1341_v16, %v3139_v1  ;;  %v1650_v49 = vrot.slane %v1343_v3, %v3141_v30 }
 0x1d9   : > { %v3213_v51 = vsel %vm1798_vm12, %v1637_v17, %v1797_v44 }
 0x1db   : > { %v1359_v58 = vpop.xlane.xlu0 %1358  ;;  %v3215_v4 = vpop.xlane.xlu1 %1350 }
 0x1dc   : > { %v1689_v2 = vrot.slane %v1359_v58, %v3141_v30 }
 0x1df   : > { %v1339_v20 = vpop.xlane.xlu0 %1338  ;;  %v1347_v62 = vpop.xlane.xlu1 %1346 }
 0x1e0   : > { %v1641_v56 = vrot.slane %v1339_v20, %v3137_v60  ;;  %v1660_v44 = vrot.slane %v1347_v62, %v3154_v63  ;;  %v1670_v62 = vrot.slane %v3215_v4, %v3166_v15 }
 0x1e2   : > { %v1646_v9 = vsel %vm1477_vm3, %v1645_v10, %v1641_v56 }
 0x1e3   : > { %v1361_v33 = vpop.xlane.xlu0 %1360  ;;  %v1363_v42 = vpop.xlane.xlu1 %1362  ;;  %v1651_v8 = vsel %vm1484_vm4, %v1650_v49, %v1646_v9 }
 0x1e4   : > { %v1694_v5 = vrot.slane %v1361_v33, %v3143_v11  ;;  %v1656_v39 = vsel %vm1491_vm5, %v1655_v47, %v1651_v8  ;;  %v2705_v47 = vmov (!%p2268_p9), 0.0|0.0  }
 0x1e5   : > { %v1661_v55 = vsel %vm1498_vm6, %v1660_v44, %v1656_v39  ;;  %2533 = vmatprep.subr.bf16.mxu0 (!%p2268_p9), %v2705_v47  ;;  %2545 = vmatprep.subr.bf16.mxu1 (!%p2268_p9), %v2705_v47  ;;  %v1823_v39 = vld [vmem:[%s3491_s3 + $0x28] sm:$0xff] (!%p2268_p9) }
 0x1e7   : > { %v1357_v34 = vpop.xlane.xlu0 %1356  ;;  %v3217_v48 = vpop.xlane.xlu1 %1352 }
 0x1e8   : > { %v1684_v35 = vrot.slane %v1357_v34, %v3139_v1  ;;  %v1675_v4 = vrot.slane %v3217_v48, %v3168_v28 }
 0x1ea   : > { %v1685_v50 = vsel %vm1477_vm3, %v1684_v35, %v1680_v46 }
 0x1eb   : > { %v3219_v22 = vpop.xlane.xlu0 %1366  ;;  %v3221_v57 = vpop.xlane.xlu1 %1368  ;;  %v1690_v18 = vsel %vm1484_vm4, %v1689_v2, %v1685_v50 }
 0x1ec   : > { %v1695_v37 = vsel %vm1491_vm5, %v1694_v5, %v1690_v18  ;;  %v2707_v5 = vmov (!%p2268_p9), 0.0  }
 0x1ed   : > { %2460 = vmatprep.mubr.msk.f32.mxu0 (!%p2268_p9), %vm2706_vm2, %v2707_v5  ;;  %2495 = vmatprep.mubr.msk.f32.mxu1 (!%p2268_p9), %vm2706_vm2, %v2707_v5 }
 0x1ef   : > { %v1349_v23 = vpop.xlane.xlu0 %1348  ;;  %v1375_v53 = vpop.xlane.xlu1 %1374 }
 0x1f0   : > { %v1728_v25 = vrot.slane %v1375_v53, %v3141_v30  ;;  %v1665_v26 = vrot.slane %v1349_v23, %v3164_v27 }
 0x1f2   : > { %v1666_v17 = vsel %vm1505_vm7, %v1665_v26, %v1661_v55  ;;  %v1946_v55 = vld [vmem:[%s3495_s7 + $0x18] sm:$0xff] (!%p2268_p9) }
 0x1f3   : > { %v1365_v24 = vpop.xlane.xlu0 %1364  ;;  %v1391_v61 = vpop.xlane.xlu1 %1390 }
 0x1f4   : > { %v1704_v41 = vrot.slane %v1365_v24, %v3164_v27  ;;  %v1767_v20 = vrot.slane %v1391_v61, %v3141_v30  ;;  %v1671_v24 = vsel %vm1512_vm8, %v1670_v62, %v1666_v17  ;;  %v1949_v17 = vld [vmem:[%s3495_s7 + $0x30] sm:$0xff] (!%p2268_p9)  ;;  %v1952_v62 = vld [vmem:[%s3495_s7 + $0x48] sm:$0xff] (!%p2268_p9) }
 0x1f5   : > { %v1676_v10 = vsel %vm1519_vm9, %v1675_v4, %v1671_v24 }
 0x1f7   : > { %v1387_v54 = vpop.xlane.xlu0 %1386  ;;  %v1371_v31 = vpop.xlane.xlu1 %1370 }
 0x1f8   : > { %v1719_v36 = vrot.slane %v1371_v31, %v3137_v60  ;;  %v1758_v29 = vrot.slane %v1387_v54, %v3137_v60 }
 0x1fb   : > { %v1389_v7 = vpop.xlane.xlu1 %1388  ;;  %v1377_v32 = vpop.xlane.xlu0 %1376 }
 0x1fc   : > { %v1762_v6 = vrot.slane %v1389_v7, %v3139_v1  ;;  %v1733_v14 = vrot.slane %v1377_v32, %v3143_v11  ;;  %v1714_v7 = vrot.slane %v3221_v57, %v3168_v28 }
 0x1fe   : > { %v1763_v40 = vsel %vm1477_vm3, %v1762_v6, %v1758_v29  ;;  %v1944_v29 = vld [vmem:[%s3495_s7 + $0x8] sm:$0xff] (!%p2268_p9) }
 0x1ff   : > { %v1393_v45 = vpop.xlane.xlu0 %1392  ;;  %v1379_v59 = vpop.xlane.xlu1 %1378  ;;  %v1768_v23 = vsel %vm1484_vm4, %v1767_v20, %v1763_v40 }
 0x200   : > { %v1772_v43 = vrot.slane %v1393_v45, %v3143_v11  ;;  %v1738_v3 = vrot.slane %v1379_v59, %v3154_v63  ;;  %v1709_v11 = vrot.slane %v3219_v22, %v3166_v15 }
 0x202   : > { %v1773_v30 = vsel %vm1491_vm5, %v1772_v43, %v1768_v23  ;;  %v1947_v43 = vld [vmem:[%s3495_s7 + $0x20] sm:$0xff] (!%p2268_p9) }
 0x203   : > { %v1373_v12 = vpop.xlane.xlu0 %1372  ;;  %v1381_v0 = vpop.xlane.xlu1 %1380  ;;  %v1955_v23 = vld [vmem:[%s3495_s7 + $0x60] sm:$0xff] (!%p2268_p9) }
 0x204   : > { %v1723_v13 = vrot.slane %v1373_v12, %v3139_v1  ;;  %v1699_v1 = vrot.slane %v1363_v42, %v3154_v63  ;;  %v1743_v53 = vrot.slane %v1381_v0, %v3164_v27  ;;  %v1273_v12 = vld [vmem:[#allocation2] sm:$0xff] }
 0x206   : > { %v1724_v19 = vsel %vm1477_vm3, %v1723_v13, %v1719_v36  ;;  %v1700_v58 = vsel %vm1498_vm6, %v1699_v1, %v1695_v37 }
 0x207   : > { %v1729_v21 = vsel %vm1484_vm4, %v1728_v25, %v1724_v19  ;;  %v1383_v38 = vpop.xlane.xlu0 %1382  ;;  %v1397_v16 = vpop.xlane.xlu1 %1396  ;;  %v1705_v33 = vsel %vm1505_vm7, %v1704_v41, %v1700_v58  ;;  %v1821_v25 = vld [vmem:[%s3491_s3 + $0x18] sm:$0xff] (!%p2268_p9)  ;;  %v1822_v19 = vld [vmem:[%s3491_s3 + $0x20] sm:$0xff] (!%p2268_p9) }
 0x208   : > { %v1734_v52 = vsel %vm1491_vm5, %v1733_v14, %v1729_v21  ;;  %v1748_v61 = vrot.slane %v1383_v38, %v3166_v15  ;;  %v1710_v54 = vsel %vm1512_vm8, %v1709_v11, %v1705_v33  ;;  %v1782_v32 = vrot.slane %v1397_v16, %v3164_v27  ;;  %v1824_v14 = vld [vmem:[%s3491_s3 + $0x30] sm:$0xff] (!%p2268_p9)  ;;  %v1825_v21 = vld [vmem:[%s3491_s3 + $0x38] sm:$0xff] (!%p2268_p9)  ;;  %v1943_v41 = vld [vmem:[%s3495_s7] sm:$0xff] (!%p2268_p9) }
 0x209   : > { %v1739_v42 = vsel %vm1498_vm6, %v1738_v3, %v1734_v52  ;;  %v1715_v48 = vsel %vm1519_vm9, %v1714_v7, %v1710_v54  ;;  %v1801_v27 = vsel %vm1800_vm13, %v1676_v10, %v3213_v51  ;;  %v1820_v51 = vld [vmem:[%s3491_s3 + $0x10] sm:$0xff] (!%p2268_p9)  ;;  %v2540_v26 = vpack.c.bf16 (!%p2268_p9), %v1823_v39, %v1822_v19  ;;  %v1948_v3 = vld [vmem:[%s3495_s7 + $0x28] sm:$0xff] (!%p2268_p9)  ;;  %v1950_v58 = vld [vmem:[%s3495_s7 + $0x38] sm:$0xff] (!%p2268_p9) }
 0x20a   : > { %v1803_v2 = vsel %vm1802_vm14, %v1715_v48, %v1801_v27  ;;  %v2537_v6 = vpack.c.bf16 (!%p2268_p9), %v1821_v25, %v1820_v51  ;;  %v2543_v38 = vpack.c.bf16 (!%p2268_p9), %v1825_v21, %v1824_v14  ;;  %v2546_v1 = vpack.c.bf16 (!%p2268_p9), %v1944_v29, %v1943_v41  ;;  %v1945_v52 = vld [vmem:[%s3495_s7 + $0x10] sm:$0xff] (!%p2268_p9)  ;;  %v2269_v54 = vld [vmem:[%s3492_s4] ss:$0 sm:$0xff] (!%p2268_p9)  ;;  %v2075_v39 = vld [vmem:[%s3499_s11 + $0x18] sm:$0xff] (!%p2268_p9) }
 0x20b   : > { %v1395_v60 = vpop.xlane.xlu0 %1394  ;;  %v1399_v56 = vpop.xlane.xlu1 %1398  ;;  %v2549_v40 = vpack.c.bf16 (!%p2268_p9), %v1946_v55, %v1945_v52  ;;  %v2552_v16 = vpack.c.bf16 (!%p2268_p9), %v1948_v3, %v1947_v43  ;;  %v2555_v20 = vpack.c.bf16 (!%p2268_p9), %v1950_v58, %v1949_v17  ;;  %v2072_v25 = vld [vmem:[%s3499_s11] sm:$0xff] (!%p2268_p9)  ;;  %v2074_v19 = vld [vmem:[%s3499_s11 + $0x10] sm:$0xff] (!%p2268_p9)  ;;  %v2077_v21 = vld [vmem:[%s3499_s11 + $0x28] sm:$0xff] (!%p2268_p9) }
 0x20c   : > { %v1777_v34 = vrot.slane %v1395_v60, %v3154_v63  ;;  %v1744_v63 = vsel %vm1505_vm7, %v1743_v53, %v1739_v42  ;;  %v1787_v46 = vrot.slane %v1399_v56, %v3166_v15  ;;  %v1818_v15 = vld [vmem:[%s3491_s3] sm:$0xff] (!%p2268_p9)  ;;  %2547 = vmatpush3.bf16.msra.mxu1 (!%p2268_p9), %v2546_v1  ;;  %v1953_v42 = vld [vmem:[%s3495_s7 + $0x50] sm:$0xff] (!%p2268_p9)  ;;  %v1956_v53 = vld [vmem:[%s3495_s7 + $0x68] sm:$0xff] (!%p2268_p9) }
 0x20d   : > { %v1749_v45 = vsel %vm1512_vm8, %v1748_v61, %v1744_v63  ;;  %2548 = vmatprep.subr.bf16.mxu1 (!%p2268_p9), %v2705_v47  ;;  %v1951_v60 = vld [vmem:[%s3495_s7 + $0x40] sm:$0xff] (!%p2268_p9)  ;;  %v2564_v24 = vpack.c.bf16 (!%p2268_p9), %v1956_v53, %v1955_v23  ;;  %v1958_v61 = vld [vmem:[%s3495_s7 + $0x78] sm:$0xff] (!%p2268_p9)  ;;  %v2081_v1 = vld [vmem:[%s3499_s11 + $0x48] sm:$0xff] (!%p2268_p9) }
 0x20e   : > { %v1778_v31 = vsel %vm1498_vm6, %v1777_v34, %v1773_v30  ;;  %v2558_v33 = vpack.c.bf16 (!%p2268_p9), %v1952_v62, %v1951_v60  ;;  %v1954_v34 = vld [vmem:[%s3495_s7 + $0x58] sm:$0xff] (!%p2268_p9)  ;;  %v1957_v30 = vld [vmem:[%s3495_s7 + $0x70] sm:$0xff] (!%p2268_p9)  ;;  %v2076_v14 = vld [vmem:[%s3499_s11 + $0x20] sm:$0xff] (!%p2268_p9) }
 0x20f   : > { %v1385_v22 = vpop.xlane.xlu0 %1384  ;;  %v1783_v59 = vsel %vm1505_vm7, %v1782_v32, %v1778_v31  ;;  %v2561_v11 = vpack.c.bf16 (!%p2268_p9), %v1954_v34, %v1953_v42  ;;  %v2567_v4 = vpack.c.bf16 (!%p2268_p9), %v1958_v61, %v1957_v30  ;;  %v2080_v29 = vld [vmem:[%s3499_s11 + $0x40] sm:$0xff] (!%p2268_p9)  ;;  %v2082_v55 = vld [vmem:[%s3499_s11 + $0x50] sm:$0xff] (!%p2268_p9) }
 0x210   : > { %v1753_v35 = vrot.slane %v1385_v22, %v3168_v28  ;;  %v1788_v50 = vsel %vm1512_vm8, %v1787_v46, %v1783_v59  ;;  %2550 = vmatpush3.bf16.msra.mxu1 (!%p2268_p9), %v2549_v40  ;;  %v2582_v52 = vpack.c.bf16 (!%p2268_p9), %v2081_v1, %v2080_v29  ;;  %v2083_v40 = vld [vmem:[%s3499_s11 + $0x58] sm:$0xff] (!%p2268_p9)  ;;  %v2084_v3 = vld [vmem:[%s3499_s11 + $0x60] sm:$0xff] (!%p2268_p9)  ;;  %v2086_v58 = vld [vmem:[%s3499_s11 + $0x70] sm:$0xff] (!%p2268_p9) }
 0x211   : > { %2551 = vmatprep.subr.bf16.mxu1 (!%p2268_p9), %v2705_v47  ;;  %v2585_v43 = vpack.c.bf16 (!%p2268_p9), %v2083_v40, %v2082_v55  ;;  %v2273_v62 = vld [vmem:[%s3496_s8] ss:$0 sm:$0xff] (!%p2268_p9) }
 0x212   : > { %v1754_v57 = vsel %vm1519_vm9, %v1753_v35, %v1749_v45 }
 0x213   : > { %v1401_v9 = vpop.xlane.xlu0 %1400  ;;  %v1805_v8 = vsel %vm1804_vm15, %v1754_v57, %v1803_v2 }
 0x214   : > { %v1792_v49 = vrot.slane %v1401_v9, %v3168_v28  ;;  %1815 = sbr.rel (%p2268_p9) target bundleno = 1458 (0x5b2), region = 121  ;;  %v1819_v28 = vld [vmem:[%s3491_s3 + $0x8] sm:$0xff] (!%p2268_p9)  ;;  %2553 = vmatpush3.bf16.msra.mxu1 (!%p2268_p9), %v2552_v16 }
 0x215   : > { %v2534_v18 = vpack.c.bf16 (!%p2268_p9), %v1819_v28, %v1818_v15  ;;  %2554 = vmatprep.subr.bf16.mxu1 (!%p2268_p9), %v2705_v47  ;;  %v2272_v15 = vld [vmem:[%s3494_s6] ss:$0 sm:$0xff] (!%p2268_p9)  ;;  %v2085_v16 = vld [vmem:[%s3499_s11 + $0x68] sm:$0xff] (!%p2268_p9) }
 0x216   : > { %v1793_v36 = vsel %vm1519_vm9, %v1792_v49, %v1788_v50  ;;  %v2588_v17 = vpack.c.bf16 (!%p2268_p9), %v2085_v16, %v2084_v3 }
 0x217   : > { %v1807_v13 = vsel %vm1806_vm0, %v1793_v36, %v1805_v8  ;;  %2535 = vmatpush3.bf16.msra.mxu0 (!%p2268_p9), %v2534_v18 }
 0x218   : > { %v1809_v0 = vadd.f32 %v1807_v13, %v1273_v12  ;;  %2536 = vmatprep.subr.bf16.mxu0 (!%p2268_p9), %v2705_v47  ;;  %2556 = vmatpush3.bf16.msra.mxu1 (!%p2268_p9), %v2555_v20  ;;  %v2271_v13 = vld [vmem:[%s3493_s5] ss:$0 sm:$0xff] (!%p2268_p9)  ;;  %v2087_v20 = vld [vmem:[%s3499_s11 + $0x78] sm:$0xff] (!%p2268_p9) }
 0x219   : > { %2557 = vmatprep.subr.bf16.mxu1 (!%p2268_p9), %v2705_v47  ;;  %v2591_v60 = vpack.c.bf16 (!%p2268_p9), %v2087_v20, %v2086_v58 }
 0x21a   : > { %1811 = vst.msk [vmem:[#allocation2] sm:$0xff] %vm1810_vm1, %v1809_v0 }
 0x21b   : > { %2538 = vmatpush3.bf16.msra.mxu0 %v2537_v6 }
 0x21c   : > { %2539 = vmatprep.subr.bf16.mxu0 %v2705_v47  ;;  %2559 = vmatpush3.bf16.msra.mxu1 %v2558_v33 }
 0x21d   : > { %2560 = vmatprep.subr.bf16.mxu1 %v2705_v47 }
 0x21f   : > { %2541 = vmatpush3.bf16.msra.mxu0 %v2540_v26  ;;  %v2573_v26 = vpack.c.bf16 %v2075_v39, %v2074_v19 }
 0x220   : > { %2542 = vmatprep.subr.bf16.mxu0 %v2705_v47  ;;  %2562 = vmatpush3.bf16.msra.mxu1 %v2561_v11 }
 0x221   : > { %v1816_v44 = vld [vmem:[#allocation2] sm:$0xff]  ;;  %2563 = vmatprep.subr.bf16.mxu1 %v2705_v47 }
 0x222   : > { %v1817_v37 = vmul.f32 0.00390625, %v1816_v44  ;;  %v2078_v44 = vld [vmem:[%s3499_s11 + $0x30] sm:$0xff] }
 0x223   : > { %2544 = vmatpush3.bf16.msra.mxu0 %v2543_v38  ;;  %v2576_v38 = vpack.c.bf16 %v2077_v21, %v2076_v14 }
 0x224   : > { %2569 = vmatprep.subr.bf16.mxu0 %v2705_v47  ;;  %2565 = vmatpush3.bf16.msra.mxu1 %v2564_v24 }
 0x225   : > { %2566 = vmatprep.subr.bf16.mxu1 %v2705_v47 }
 0x226   : > { %2461 = vmatmul.mubr.msk.f32.vlgmr.msra.gmra.mrb[0].mxu0 %vm1810_vm1, %v1817_v37  ;;  %v2079_v37 = vld [vmem:[%s3499_s11 + $0x38] sm:$0xff] }
 0x227   : > { %2530 = vmatprep.mubr.msk.f32.mxu0 %vm2706_vm2, %v2707_v5  ;;  %v2073_v5 = vld [vmem:[%s3499_s11 + $0x8] sm:$0xff]  ;;  %v2579_v41 = vpack.c.bf16 %v2079_v37, %v2078_v44 }
 0x228   : > { %2568 = vmatpush3.bf16.msra.mxu1 %v2567_v4  ;;  %v2570_v6 = vpack.c.bf16 %v2073_v5, %v2072_v25 }
 0x22a   : > { %2571 = vmatpush3.bf16.msra.mxu0 %v2570_v6 }
 0x22b   : > { %2572 = vmatprep.subr.bf16.mxu0 %v2705_v47 }
 0x22e   : > { %2574 = vmatpush3.bf16.msra.mxu0 %v2573_v26 }
 0x22f   : > { %2575 = vmatprep.subr.bf16.mxu0 %v2705_v47 }
 0x232   : > { %2577 = vmatpush3.bf16.msra.mxu0 %v2576_v38 }
 0x233   : > { %2578 = vmatprep.subr.bf16.mxu0 %v2705_v47 }
 0x236   : > { %2580 = vmatpush3.bf16.msra.mxu0 %v2579_v41 }
 0x237   : > { %2581 = vmatprep.subr.bf16.mxu0 %v2705_v47 }
 0x23a   : > { %2583 = vmatpush3.bf16.msra.mxu0 %v2582_v52 }
 0x23b   : > { %2584 = vmatprep.subr.bf16.mxu0 %v2705_v47 }
 0x23e   : > { %2586 = vmatpush3.bf16.msra.mxu0 %v2585_v43 }
 0x23f   : > { %2587 = vmatprep.subr.bf16.mxu0 %v2705_v47 }
 0x242   : > { %2589 = vmatpush3.bf16.msra.mxu0 %v2588_v17 }
 0x243   : > { %2590 = vmatprep.subr.bf16.mxu0 %v2705_v47 }
 0x246   : > { %2592 = vmatpush3.bf16.msra.mxu0 %v2591_v60 }
 0x2f9   : > { %v1902_v63 = vpop.f32.mrb[0].mxu0 }
 0x2fa   : > { %v1903_v31 = vadd.f32 %v2269_v54, %v1902_v63  ;;  %v2462_v22 = vpop.f32.mrb[1].mxu0 }
 0x2fc   : > { %v1906_v7 = vrot.slane %v1903_v31, 4 }
 0x2fe   : > { %v1907_v32 = vadd.f32 %v1906_v7, %v1903_v31 }
 0x300   : > { %v1908_v56 = vrot.slane %v1907_v32, 2 }
 0x302   : > { %v1909_v35 = vadd.f32 %v1908_v56, %v1907_v32 }
 0x304   : > { %v1910_v10 = vrot.slane %v1909_v35, 1 }
 0x306   : > { %v1911_v48 = vadd.f32 %v1910_v10, %v1909_v35 }
 0x308   : > { %v1913_v45 = vmul.f32 0.125, %v1911_v48 }
 0x30a   : > { %v1914_v59 = vsub.f32 %v1903_v31, %v1913_v45  ;;  %v2274_v45 = vld [vmem:[%s3497_s9] ss:$0 sm:$0xff] }
 0x30c   : > { %v1915_v46 = vmul.f32 %v1914_v59, %v1914_v59 }
 0x30e   : > { %v1916_v57 = vrot.slane %v1915_v46, 4 }
 0x310   : > { %v1917_v9 = vadd.f32 %v1916_v57, %v1915_v46  ;;  %v2275_v46 = vld [vmem:[%s3498_s10] ss:$0 sm:$0xff] }
 0x312   : > { %v1918_v27 = vrot.slane %v1917_v9, 2 }
 0x314   : > { %v1919_v49 = vadd.f32 %v1918_v27, %v1917_v9 }
 0x316   : > { %v1920_v50 = vrot.slane %v1919_v49, 1 }
 0x318   : > { %v1921_v2 = vadd.f32 %v1920_v50, %v1919_v49  ;;  %v2276_v49 = vld [vmem:[%s3500_s12] ss:$0 sm:$0xff] }
 0x31a   : > { %v1922_v12 = vmul.f32 0.125, %v1921_v2 }
 0x31c   : > { %v1923_v8 = vadd.f32 1e-05, %v1922_v12 }
 0x31e   : > { %2643 = vrsqrt.f32 %v1923_v8 }
 0x328   : > { %v2644_v36 = vpop.eup %2643 }
 0x329   : > { %v1925_v0 = vmul.f32 %v2644_v36, %v1914_v59 }
 0x32b   : > { %v1933_v28 = vmul.f32 %v2271_v13, %v1925_v0 }
 0x32d   : > { %v1941_v51 = vadd.f32 %v2272_v15, %v1933_v28 }
 0x32f   : > { %v1942_v18 = vmax.f32 %v1941_v51, 0.0 }
 0x331   : > { %2496 = vmatmul.mubr.f32.vlgmr.msra.gmra.mrb[0].mxu1 %v1942_v18 }
 0x404   : > { %v2032_v33 = vpop.f32.mrb[0].mxu1 }
 0x405   : > { %v2033_v42 = vadd.f32 %v2273_v62, %v2032_v33  ;;  %v2497_v34 = vpop.f32.mrb[1].mxu1 }
 0x407   : > { %v2036_v11 = vrot.slane %v2033_v42, 4 }
 0x409   : > { %v2037_v23 = vadd.f32 %v2036_v11, %v2033_v42 }
 0x40b   : > { %v2038_v47 = vrot.slane %v2037_v23, 2 }
 0x40d   : > { %v2039_v53 = vadd.f32 %v2038_v47, %v2037_v23 }
 0x40f   : > { %v2040_v24 = vrot.slane %v2039_v53, 1 }
 0x411   : > { %v2041_v30 = vadd.f32 %v2040_v24, %v2039_v53 }
 0x413   : > { %v2042_v61 = vmul.f32 0.125, %v2041_v30 }
 0x415   : > { %v2043_v4 = vsub.f32 %v2033_v42, %v2042_v61 }
 0x417   : > { %v2044_v54 = vmul.f32 %v2043_v4, %v2043_v4 }
 0x419   : > { %v2045_v63 = vrot.slane %v2044_v54, 4 }
 0x41b   : > { %v2046_v31 = vadd.f32 %v2045_v63, %v2044_v54 }
 0x41d   : > { %v2047_v22 = vrot.slane %v2046_v31, 2 }
 0x41f   : > { %v2048_v7 = vadd.f32 %v2047_v22, %v2046_v31 }
 0x421   : > { %v2049_v32 = vrot.slane %v2048_v7, 1 }
 0x423   : > { %v2050_v56 = vadd.f32 %v2049_v32, %v2048_v7 }
 0x425   : > { %v2051_v35 = vmul.f32 0.125, %v2050_v56 }
 0x427   : > { %v2052_v10 = vadd.f32 1e-05, %v2051_v35 }
 0x429   : > { %2645 = vrsqrt.f32 %v2052_v10 }
 0x433   : > { %v2646_v48 = vpop.eup %2645 }
 0x434   : > { %v2054_v59 = vmul.f32 %v2646_v48, %v2043_v4 }
 0x436   : > { %v2062_v57 = vmul.f32 %v2274_v45, %v2054_v59 }
 0x438   : > { %v2070_v9 = vadd.f32 %v2275_v46, %v2062_v57 }
 0x43a   : > { %v2071_v27 = vmax.f32 %v2070_v9, 0.0 }
 0x43c   : > { %2531 = vmatmul.mubr.f32.vlgmr.msra.gmra.mrb[2].mxu0 %v2071_v27 }
 0x50f   : > { %v2161_v50 = vpop.f32.mrb[2].mxu0 }
 0x510   : > { %v2162_v2 = vadd.f32 %v2276_v49, %v2161_v50  ;;  %v2532_v12 = vpop.f32.mrb[3].mxu0 }
 0x512   : > { %v2165_v8 = vmul.f32 %v2162_v2, %v2162_v2 }
 0x514   : > { %2166 = vadd.xlane.f32.xlu0 %v2165_v8 }
 0x5a1   : > { %v2167_v36 = vpop.xlane.xlu0 %2166 }
 0x5a2   : > { %v2168_v13 = vmax.f32 %v2167_v36, 1e-24 }
 0x5a4   : > { %2647 = vrsqrt.f32 %v2168_v13 }
 0x5ae   : > { %v2648_v0 = vpop.eup %2647 }
 0x5af   : > { %v2170_v15 = vmul.f32 %v2648_v0, %v2162_v2 }
 0x5b1   : > { %2171 = vst [vmem:[#allocation4] sm:$0xff] %v2170_v15 }
 0x5b2 PF: > { %p2605_p10 = scmp.eq.s32.totalorder %s2795_s28, 1  ;;  %s2708_s25 = smov [#allocation4]  }
 0x5b3   : > { %s2179_s16 = sshll.u32 %s2708_s25, 4  ;;  %s2180_s16 = int_to_ptr.vmem [resolvable:$true] %s2179_s16 }
 0x5b4   : > { %s2649_s17 = scalar_lea.vmem %s2180_s16, 128  ;;  %p2656_p0 = scmp.lt.s32.totalorder %s2180_s16, %s2180_s16 }
 0x5b5   : > { %p2650_p11 = scmp.ne.s32.totalorder %s2180_s16, %s2649_s17  ;;  %p2657_p1 = scmp.lt.s32.totalorder %s2649_s17, %s2649_s17 }
 0x5b7   : > { %p2651_p12 = pnand %p2650_p11, %p2605_p10  ;;  %p2658_p2 = por %p2657_p1, %p2656_p0 }
 0x5b9   : > { %p2652_p13 = pneg %p2651_p12 }
 0x5bb   : > { %p2659_p3 = pnand %p2658_p2, %p2652_p13 }
 0x5bd   : > { %2662 = shalt.err (!%p2659_p3)
}
 0x5be   : > { %s2663_s20 = scalar_lea.hbm %s3501_s13, 128 }
 0x5bf   : > { %p2664_p4 = scmp.ne.s32.totalorder %s3501_s13, %s2663_s20  ;;  %p2669_p7 = scmp.lt.u32.totalorder %s2663_s20, %s3501_s13 }
 0x5c1   : > { %p2665_p5 = pnand %p2664_p4, %p2605_p10 }
 0x5c3   : > { %p2666_p6 = pneg %p2665_p5 }
 0x5c5   : > { %p2671_p8 = pnand %p2669_p7, %p2666_p6 }
 0x5c7   : > { %2674 = shalt.err (!%p2671_p8)
}
 0x5c8   : > { %2602 = dma.vmem_to_hbm [thread:$0]  (%p2605_p10), %s2180_s16, 128, %s3501_s13, [#allocation5]  }
 0x5c9   : > { %2688 = dma.done.wait (%p2605_p10), [#allocation5], 128  }
 0x5ca   : > { %2690 = vsyncadd (%p2605_p10), [#allocation5], 4294967168 }
 0x5cb PF: > { %p21_p9 = scmp.ge.s32.totalorder %s2798_s29, 4   ;;  %s3502_s25 = smov %s2697_s26 }
 0x5cc   : > { %s3503_s26 = smov %s2807_s15  ;;  %s3504_s27 = smov %s2798_s29 }
 0x5cd   :  { %23 = sbr.rel (!%p21_p9) target bundleno = 2 (0x2), region = 153 }
 0x5d4   :  { %2192 = vsyncpa [#allocation5], 1 }
 0x5d5   :  { %2194 = vsyncpa [#allocation5 + $0x1], 1 }

</bundles_post_ra>
